<compile_context>
chip_gen: v6e
topology: v6e:2x2x1
jax: 0.10.0
libtpu: 0.0.40
codegen_flags: <defaults>
</compile_context>

<pallas_src>
import math
import jax
import jax.numpy as jnp
from jax import lax
from jax.experimental import pallas as pl
from jax.experimental.pallas import tpu as pltpu

# ---- small synthetic BERT config ----
SEQ        = 16          # [CLS] + txt1 + txt2 + [SEP]
HID        = 128
HEADS      = 4
HEAD_DIM   = HID // HEADS
INTER      = 256
LAYERS     = 2
VOCAB      = 128
TYPE_VOCAB = 2
MAX_POS    = 64
EPS        = 1e-12       # BERT LayerNorm eps
OUT_ROWS   = 8           # rows written back (CLS is row 0); (8,128)-aligned

# rows inside the packed per-layer vector array [LAYERS, 8, HID]
_BO, _LN1G, _LN1B, _B2, _LN2G, _LN2B = 0, 1, 2, 3, 4, 5


def _layernorm(x, g, b):
    mu = jnp.mean(x, axis=-1, keepdims=True)
    var = jnp.mean((x - mu) ** 2, axis=-1, keepdims=True)
    return (x - mu) * lax.rsqrt(var + EPS) * g + b


# ----------------- fused Pallas kernel -----------------

def fused_bert_kernel(tok_ref, seg_ref, wemb_ref, pemb_ref, temb_ref, embln_ref,
                      wqkv_ref, bqkv_ref, wo_ref, w1_ref, b1_ref, w2_ref, vec_ref,
                      o_ref, h_ref, ctx_ref):
    """Grid step = one BERT encoder layer; step 0 also does embeddings + LN.

    h_ref   (VMEM scratch, f32)  carries the [SEQ, HID] hidden state.
    ctx_ref (VMEM scratch, bf16) collects per-head attention contexts.
    """
    layer = pl.program_id(0)

    # ---- step 0 only: embedding lookup (one-hot MXU gather) + embedding LN ----
    @pl.when(layer == 0)
    def _():
        tok = tok_ref[...]                                          # [SEQ, 1] i32
        onehot = (lax.broadcasted_iota(jnp.int32, (SEQ, VOCAB), 1)
                  == tok).astype(jnp.float32)                       # [SEQ, VOCAB]
        word_e = jnp.dot(onehot, wemb_ref[...],
                         preferred_element_type=jnp.float32)        # exact gather
        seg_f = (seg_ref[...] != 0).astype(jnp.float32)             # [SEQ, 1]
        type_e = (1.0 - seg_f) * temb_ref[0:1, :] + seg_f * temb_ref[1:2, :]
        emb = word_e + pemb_ref[...] + type_e                       # [SEQ, HID]
        h_ref[...] = _layernorm(emb, embln_ref[0:1, :], embln_ref[1:2, :])

    x = h_ref[...]                                                  # [SEQ, HID] f32
    xb = x.astype(jnp.bfloat16)

    # ---- fused QKV projection: one [SEQ,HID]x[HID,3*HID] MXU push ----
    qkv = jnp.dot(xb, wqkv_ref[...],
                  preferred_element_type=jnp.float32) + bqkv_ref[...]
    qkv_b = qkv.astype(jnp.bfloat16)                                # [SEQ, 3*HID]

    # ---- multi-head self-attention (per-head scores/softmax, ctx packed) ----
    scale = 1.0 / math.sqrt(HEAD_DIM)
    for h in range(HEADS):                       # static unrolled head loop
        qs = slice(h * HEAD_DIM, (h + 1) * HEAD_DIM)
        ks = slice(HID + h * HEAD_DIM, HID + (h + 1) * HEAD_DIM)
        vs = slice(2 * HID + h * HEAD_DIM, 2 * HID + (h + 1) * HEAD_DIM)
        qh, kh, vh = qkv_b[:, qs], qkv_b[:, ks], qkv_b[:, vs]
        # q @ k^T without an explicit transpose: contract dim 1 of both.
        s = lax.dot_general(qh, kh, (((1,), (1,)), ((), ())),
                            preferred_element_type=jnp.float32) * scale   # [S, S]
        s = s - jnp.max(s, axis=-1, keepdims=True)
        p = jnp.exp(s)
        p = p * pl.reciprocal(jnp.sum(p, axis=-1, keepdims=True), approx=True)
        ctx_h = jnp.dot(p.astype(jnp.bfloat16), vh,
                        preferred_element_type=jnp.float32)               # [S, Dh]
        ctx_ref[:, qs] = ctx_h.astype(jnp.bfloat16)

    # One full-K output projection instead of 4 K=32 matmuls.
    attn = jnp.dot(ctx_ref[...], wo_ref[...],
                   preferred_element_type=jnp.float32) + vec_ref[_BO:_BO + 1, :]

    h1 = _layernorm(x + attn, vec_ref[_LN1G:_LN1G + 1, :], vec_ref[_LN1B:_LN1B + 1, :])

    # ---- feed-forward ----
    ff = jnp.dot(h1.astype(jnp.bfloat16), w1_ref[...],
                 preferred_element_type=jnp.float32) + b1_ref[...]
    # TODO(synk): BERT uses exact erf-GELU; tanh-approx GELU (EUP) used here,
    # max abs deviation ~1e-3.
    ff = jax.nn.gelu(ff, approximate=True)
    ff = jnp.dot(ff.astype(jnp.bfloat16), w2_ref[...],
                 preferred_element_type=jnp.float32) + vec_ref[_B2:_B2 + 1, :]

    new_h = _layernorm(h1 + ff, vec_ref[_LN2G:_LN2G + 1, :], vec_ref[_LN2B:_LN2B + 1, :])
    h_ref[...] = new_h

    # Write back only the final layer's leading rows (CLS is row 0).
    @pl.when(layer == LAYERS - 1)
    def _():
        o_ref[...] = new_h[0:OUT_ROWS, :]


# ----------------- wrappers -----------------

def _const_spec(shape):
    """Full-array block, same block every grid step (resident in VMEM)."""
    nd = len(shape)
    return pl.BlockSpec(shape, lambda l, _nd=nd: (0,) * _nd)


def _stacked_spec(shape_tail):
    """Per-layer slice of a [LAYERS, ...] stacked array (leading dim squeezed)."""
    nz = len(shape_tail)
    return pl.BlockSpec((None,) + tuple(shape_tail),
                        lambda l, _nz=nz: (l,) + (0,) * _nz)


def init_params(key):
    """Deterministic synthetic BERT weights (std=0.02, LN gamma=1 / beta=0)."""
    def nrm(k, shape):
        return 0.02 * jax.random.normal(k, shape, dtype=jnp.float32)

    keys = jax.random.split(key, 3 + LAYERS)
    params = {
        "word_emb": nrm(keys[0], (VOCAB, HID)),
        "pos_emb":  nrm(keys[1], (MAX_POS, HID)),
        "type_emb": nrm(keys[2], (TYPE_VOCAB, HID)),
        "emb_ln_g": jnp.ones((1, HID), jnp.float32),
        "emb_ln_b": jnp.zeros((1, HID), jnp.float32),
        "layers": [],
    }
    for li in range(LAYERS):
        lk = jax.random.split(keys[3 + li], 6)
        params["layers"].append({
            "wq": nrm(lk[0], (HID, HID)),  "bq": jnp.zeros((1, HID), jnp.float32),
            "wk": nrm(lk[1], (HID, HID)),  "bk": jnp.zeros((1, HID), jnp.float32),
            "wv": nrm(lk[2], (HID, HID)),  "bv": jnp.zeros((1, HID), jnp.float32),
            "wo": nrm(lk[3], (HID, HID)),  "bo": jnp.zeros((1, HID), jnp.float32),
            "ln1g": jnp.ones((1, HID), jnp.float32),
            "ln1b": jnp.zeros((1, HID), jnp.float32),
            "w1": nrm(lk[4], (HID, INTER)), "b1": jnp.zeros((1, INTER), jnp.float32),
            "w2": nrm(lk[5], (INTER, HID)), "b2": jnp.zeros((1, HID), jnp.float32),
            "ln2g": jnp.ones((1, HID), jnp.float32),
            "ln2b": jnp.zeros((1, HID), jnp.float32),
        })
    return params


def matching_component_forward(params, token_ids, segment_ids):
    """Equivalent of Matching_Component.forward given pre-tokenized ids.

    Returns cls_rep: final-layer hidden state at position 0, shape [HID].
    """
    tok = token_ids.reshape(SEQ, 1).astype(jnp.int32)
    seg = segment_ids.reshape(SEQ, 1).astype(jnp.int32)
    pos_emb = params["pos_emb"][:SEQ]          # position ids are arange(SEQ)

    bf = jnp.bfloat16
    layers = params["layers"]

    # --- packed / stacked per-layer parameters (host-side, free) ---
    wqkv = jnp.stack([jnp.concatenate([lp["wq"], lp["wk"], lp["wv"]], axis=1)
                      for lp in layers]).astype(bf)                     # [L,HID,3H]
    bqkv = jnp.stack([jnp.concatenate([lp["bq"], lp["bk"], lp["bv"]], axis=1)
                      for lp in layers])                                # [L,1,3H]
    wo = jnp.stack([lp["wo"] for lp in layers]).astype(bf)              # [L,HID,HID]
    w1 = jnp.stack([lp["w1"] for lp in layers]).astype(bf)              # [L,HID,INT]
    b1 = jnp.stack([lp["b1"] for lp in layers])                         # [L,1,INT]
    w2 = jnp.stack([lp["w2"] for lp in layers]).astype(bf)              # [L,INT,HID]
    pad2 = jnp.zeros((2, HID), jnp.float32)
    vecs = jnp.stack([jnp.concatenate(
        [lp["bo"], lp["ln1g"], lp["ln1b"], lp["b2"], lp["ln2g"], lp["ln2b"], pad2],
        axis=0) for lp in layers])                                      # [L,8,HID]
    embln = jnp.concatenate([params["emb_ln_g"], params["emb_ln_b"]], axis=0)

    args = (
        tok, seg,
        params["word_emb"], pos_emb, params["type_emb"], embln,
        wqkv, bqkv, wo, w1, b1, w2, vecs,
    )

    in_specs = [
        _const_spec((SEQ, 1)), _const_spec((SEQ, 1)),
        _const_spec((VOCAB, HID)), _const_spec((SEQ, HID)),
        _const_spec((TYPE_VOCAB, HID)), _const_spec((2, HID)),
        _stacked_spec((HID, 3 * HID)), _stacked_spec((1, 3 * HID)),   # wqkv, bqkv
        _stacked_spec((HID, HID)),                                    # wo
        _stacked_spec((HID, INTER)), _stacked_spec((1, INTER)),       # w1, b1
        _stacked_spec((INTER, HID)),                                  # w2
        _stacked_spec((8, HID)),                                      # packed vecs
    ]

    flops = (LAYERS * (2 * SEQ * HID * (3 * HID + HID + 2 * INTER)
                       + 4 * SEQ * SEQ * HID)
             + 2 * SEQ * VOCAB * HID)
    transcendentals = LAYERS * (HEADS * SEQ * SEQ + SEQ * INTER + 4 * SEQ)
    bytes_accessed = int(sum(int(a.size) * a.dtype.itemsize for a in args)
                         + OUT_ROWS * HID * 4)

    h = pl.pallas_call(
        fused_bert_kernel,
        out_shape=jax.ShapeDtypeStruct((OUT_ROWS, HID), jnp.float32),
        grid_spec=pltpu.PrefetchScalarGridSpec(
            num_scalar_prefetch=0,
            grid=(LAYERS,),
            in_specs=in_specs,
            out_specs=pl.BlockSpec((OUT_ROWS, HID), lambda l: (0, 0)),
            scratch_shapes=[pltpu.VMEM((SEQ, HID), jnp.float32),
                            pltpu.VMEM((SEQ, HID), jnp.bfloat16)],
        ),
        compiler_params=pltpu.CompilerParams(
            dimension_semantics=("arbitrary",),
            vmem_limit_bytes=32 * 1024 * 1024),
        cost_estimate=pl.CostEstimate(flops=flops,
                                      transcendentals=transcendentals,
                                      bytes_accessed=bytes_accessed),
    )(*args)

    # encoded_layers.squeeze(0)[0] -> CLS representation
    return h[0]


if __name__ == "__main__":
    key = jax.random.PRNGKey(0)
    pkey, tkey = jax.random.split(key)
    params = init_params(pkey)

    # Deterministic stand-in for tokenizer output:
    # [CLS] + text1 tokens (segment 0), then text2 tokens + [SEP] (segment 1).
    token_ids = jax.random.randint(tkey, (SEQ,), 0, VOCAB, dtype=jnp.int32)
    segment_ids = jnp.concatenate(
        [jnp.zeros((SEQ // 2,), jnp.int32), jnp.ones((SEQ - SEQ // 2,), jnp.int32)])

    cls_rep = matching_component_forward(params, token_ids, segment_ids)
    cls_rep = jax.block_until_ready(cls_rep)
    assert cls_rep.shape == (HID,) and cls_rep.dtype == jnp.float32
    assert bool(jnp.all(jnp.isfinite(cls_rep)))
    print("KERNEL_OK")
</pallas_src>

<mosaic_0001>
module attributes {stable_mosaic.version = 11 : i64} {
  func.func @fused_bert_kernel(%arg0: i32, %arg1: memref<16x1xi32, #tpu.memory_space<vmem>>, %arg2: memref<16x1xi32, #tpu.memory_space<vmem>>, %arg3: memref<128x128xf32, #tpu.memory_space<vmem>>, %arg4: memref<16x128xf32, #tpu.memory_space<vmem>>, %arg5: memref<2x128xf32, #tpu.memory_space<vmem>>, %arg6: memref<2x128xf32, #tpu.memory_space<vmem>>, %arg7: memref<1x128x384xbf16, #tpu.memory_space<vmem>>, %arg8: memref<1x1x384xf32, #tpu.memory_space<vmem>>, %arg9: memref<1x128x128xbf16, #tpu.memory_space<vmem>>, %arg10: memref<1x128x256xbf16, #tpu.memory_space<vmem>>, %arg11: memref<1x1x256xf32, #tpu.memory_space<vmem>>, %arg12: memref<1x256x128xbf16, #tpu.memory_space<vmem>>, %arg13: memref<1x8x128xf32, #tpu.memory_space<vmem>>, %arg14: memref<8x128xf32, #tpu.memory_space<vmem>>, %arg15: memref<16x128xf32, #tpu.memory_space<vmem>>, %arg16: memref<16x128xbf16, #tpu.memory_space<vmem>>) attributes {dimension_semantics = [#tpu.dimension_semantics<arbitrary>], iteration_bounds = array<i64: 2>, scalar_prefetch = 0 : i64, scratch_operands = 2 : i64, tpu.core_type = #tpu.core_type<tc>, window_params = [{pipeline_mode = #tpu.pipeline_mode<synchronous>, transform_indices = @transform_0, window_bounds = array<i64: 16, 1>}, {pipeline_mode = #tpu.pipeline_mode<synchronous>, transform_indices = @transform_1, window_bounds = array<i64: 16, 1>}, {pipeline_mode = #tpu.pipeline_mode<synchronous>, transform_indices = @transform_2, window_bounds = array<i64: 128, 128>}, {pipeline_mode = #tpu.pipeline_mode<synchronous>, transform_indices = @transform_3, window_bounds = array<i64: 16, 128>}, {pipeline_mode = #tpu.pipeline_mode<synchronous>, transform_indices = @transform_4, window_bounds = array<i64: 2, 128>}, {pipeline_mode = #tpu.pipeline_mode<synchronous>, transform_indices = @transform_5, window_bounds = array<i64: 2, 128>}, {transform_indices = @transform_6, window_bounds = array<i64: 1, 128, 384>}, {transform_indices = @transform_7, window_bounds = array<i64: 1, 1, 384>}, {transform_indices = @transform_8, window_bounds = array<i64: 1, 128, 128>}, {transform_indices = @transform_9, window_bounds = array<i64: 1, 128, 256>}, {transform_indices = @transform_10, window_bounds = array<i64: 1, 1, 256>}, {transform_indices = @transform_11, window_bounds = array<i64: 1, 256, 128>}, {transform_indices = @transform_12, window_bounds = array<i64: 1, 8, 128>}, {pipeline_mode = #tpu.pipeline_mode<synchronous>, transform_indices = @transform_13, window_bounds = array<i64: 8, 128>}]} {
    %c0_i32 = arith.constant 0 : i32
    %0 = arith.cmpi eq, %arg0, %c0_i32 : i32
    %1 = arith.extui %0 : i1 to i32
    %c0_i32_0 = arith.constant 0 : i32
    %2 = arith.cmpi ne, %1, %c0_i32_0 : i32
    scf.if %2 {
      %c0_80 = arith.constant 0 : index
      %c0_81 = arith.constant 0 : index
      %188 = vector.load %arg1[%c0_80, %c0_81] : memref<16x1xi32, #tpu.memory_space<vmem>>, vector<16x1xi32>
      %189 = tpu.iota {dimensions = array<i32: 1>} : vector<16x128xi32>
      %190 = vector.broadcast %188 : vector<16x1xi32> to vector<16x128xi32>
      %191 = arith.cmpi eq, %189, %190 : vector<16x128xi32>
      %192 = arith.extui %191 : vector<16x128xi1> to vector<16x128xi32>
      %193 = arith.sitofp %192 : vector<16x128xi32> to vector<16x128xf32>
      %c0_82 = arith.constant 0 : index
      %c0_83 = arith.constant 0 : index
      %194 = vector.load %arg3[%c0_82, %c0_83] : memref<128x128xf32, #tpu.memory_space<vmem>>, vector<128x128xf32>
      %cst_84 = arith.constant dense<0.000000e+00> : vector<16x128xf32>
      %195 = tpu.matmul %193, %194, %cst_84 {dimension_numbers = #tpu.dot_dimension_numbers<[1], [0], [0], [1], [0, 0, 1, 1], [], []>} : vector<16x128xf32>, vector<128x128xf32>, vector<16x128xf32> -> vector<16x128xf32>
      %c0_85 = arith.constant 0 : index
      %c0_86 = arith.constant 0 : index
      %196 = vector.load %arg2[%c0_85, %c0_86] : memref<16x1xi32, #tpu.memory_space<vmem>>, vector<16x1xi32>
      %c0_i32_87 = arith.constant 0 : i32
      %197 = vector.broadcast %c0_i32_87 : i32 to vector<16x1xi32>
      %198 = arith.cmpi ne, %196, %197 : vector<16x1xi32>
      %199 = arith.extui %198 : vector<16x1xi1> to vector<16x1xi32>
      %200 = arith.sitofp %199 : vector<16x1xi32> to vector<16x1xf32>
      %cst_88 = arith.constant 1.000000e+00 : f32
      %201 = vector.broadcast %cst_88 : f32 to vector<16x1xf32>
      %202 = arith.subf %201, %200 : vector<16x1xf32>
      %c0_89 = arith.constant 0 : index
      %c0_90 = arith.constant 0 : index
      %203 = vector.load %arg5[%c0_89, %c0_90] : memref<2x128xf32, #tpu.memory_space<vmem>>, vector<1x128xf32>
      %204 = vector.broadcast %202 : vector<16x1xf32> to vector<16x128xf32>
      %205 = vector.broadcast %203 : vector<1x128xf32> to vector<16x128xf32>
      %206 = arith.mulf %204, %205 : vector<16x128xf32>
      %c1_91 = arith.constant 1 : index
      %c0_92 = arith.constant 0 : index
      %207 = vector.load %arg5[%c1_91, %c0_92] : memref<2x128xf32, #tpu.memory_space<vmem>>, vector<1x128xf32>
      %208 = vector.broadcast %200 : vector<16x1xf32> to vector<16x128xf32>
      %209 = vector.broadcast %207 : vector<1x128xf32> to vector<16x128xf32>
      %210 = arith.mulf %208, %209 : vector<16x128xf32>
      %211 = arith.addf %206, %210 : vector<16x128xf32>
      %c0_93 = arith.constant 0 : index
      %c0_94 = arith.constant 0 : index
      %212 = vector.load %arg4[%c0_93, %c0_94] : memref<16x128xf32, #tpu.memory_space<vmem>>, vector<16x128xf32>
      %213 = arith.addf %195, %212 : vector<16x128xf32>
      %214 = arith.addf %213, %211 : vector<16x128xf32>
      %c0_95 = arith.constant 0 : index
      %c0_96 = arith.constant 0 : index
      %215 = vector.load %arg6[%c0_95, %c0_96] : memref<2x128xf32, #tpu.memory_space<vmem>>, vector<1x128xf32>
      %c1_97 = arith.constant 1 : index
      %c0_98 = arith.constant 0 : index
      %216 = vector.load %arg6[%c1_97, %c0_98] : memref<2x128xf32, #tpu.memory_space<vmem>>, vector<1x128xf32>
      %cst_99 = arith.constant dense<0.000000e+00> : vector<16xf32>
      %217 = vector.multi_reduction <add>, %214, %cst_99 [1] : vector<16x128xf32> to vector<16xf32>
      %218 = vector.shape_cast %217 : vector<16xf32> to vector<16x1xf32>
      %cst_100 = arith.constant 1.280000e+02 : f32
      %219 = vector.broadcast %cst_100 : f32 to vector<16x1xf32>
      %220 = arith.divf %218, %219 : vector<16x1xf32>
      %221 = vector.broadcast %220 : vector<16x1xf32> to vector<16x128xf32>
      %222 = arith.subf %214, %221 : vector<16x128xf32>
      %223 = arith.mulf %222, %222 : vector<16x128xf32>
      %cst_101 = arith.constant dense<0.000000e+00> : vector<16xf32>
      %224 = vector.multi_reduction <add>, %223, %cst_101 [1] : vector<16x128xf32> to vector<16xf32>
      %225 = vector.shape_cast %224 : vector<16xf32> to vector<16x1xf32>
      %cst_102 = arith.constant 1.280000e+02 : f32
      %226 = vector.broadcast %cst_102 : f32 to vector<16x1xf32>
      %227 = arith.divf %225, %226 : vector<16x1xf32>
      %228 = vector.broadcast %220 : vector<16x1xf32> to vector<16x128xf32>
      %229 = arith.subf %214, %228 : vector<16x128xf32>
      %cst_103 = arith.constant 9.99999996E-13 : f32
      %230 = vector.broadcast %cst_103 : f32 to vector<16x1xf32>
      %231 = arith.addf %227, %230 : vector<16x1xf32>
      %232 = math.rsqrt %231 : vector<16x1xf32>
      %233 = vector.broadcast %232 : vector<16x1xf32> to vector<16x128xf32>
      %234 = arith.mulf %229, %233 : vector<16x128xf32>
      %235 = vector.broadcast %215 : vector<1x128xf32> to vector<16x128xf32>
      %236 = arith.mulf %234, %235 : vector<16x128xf32>
      %237 = vector.broadcast %216 : vector<1x128xf32> to vector<16x128xf32>
      %238 = arith.addf %236, %237 : vector<16x128xf32>
      %c0_104 = arith.constant 0 : index
      %c0_105 = arith.constant 0 : index
      %239 = vector.load %arg15[%c0_104, %c0_105] : memref<16x128xf32, #tpu.memory_space<vmem>>, vector<16x128xf32>
      tpu.vector_store %arg15[%c0_104, %c0_105], %238 {strides = array<i32>} : memref<16x128xf32, #tpu.memory_space<vmem>>, vector<16x128xf32>,
    } else {
    }
    %c0 = arith.constant 0 : index
    %c0_1 = arith.constant 0 : index
    %3 = vector.load %arg15[%c0, %c0_1] : memref<16x128xf32, #tpu.memory_space<vmem>>, vector<16x128xf32>
    %4 = arith.truncf %3 : vector<16x128xf32> to vector<16x128xbf16>
    %c0_2 = arith.constant 0 : index
    %c0_3 = arith.constant 0 : index
    %c0_4 = arith.constant 0 : index
    %5 = vector.load %arg7[%c0_2, %c0_3, %c0_4] : memref<1x128x384xbf16, #tpu.memory_space<vmem>>, vector<1x128x384xbf16>
    %6 = vector.shape_cast %5 : vector<1x128x384xbf16> to vector<128x384xbf16>
    %cst = arith.constant dense<0.000000e+00> : vector<16x384xf32>
    %7 = tpu.matmul %4, %6, %cst {dimension_numbers = #tpu.dot_dimension_numbers<[1], [0], [0], [1], [0, 0, 1, 1], [], []>} : vector<16x128xbf16>, vector<128x384xbf16>, vector<16x384xf32> -> vector<16x384xf32>
    %c0_5 = arith.constant 0 : index
    %c0_6 = arith.constant 0 : index
    %c0_7 = arith.constant 0 : index
    %8 = vector.load %arg8[%c0_5, %c0_6, %c0_7] : memref<1x1x384xf32, #tpu.memory_space<vmem>>, vector<1x1x384xf32>
    %9 = vector.shape_cast %8 : vector<1x1x384xf32> to vector<1x384xf32>
    %10 = vector.broadcast %9 : vector<1x384xf32> to vector<16x384xf32>
    %11 = arith.addf %7, %10 : vector<16x384xf32>
    %12 = arith.truncf %11 : vector<16x384xf32> to vector<16x384xbf16>
    %13 = vector.extract_strided_slice %12 {offsets = [0, 0], sizes = [16, 32], strides = [1, 1]} : vector<16x384xbf16> to vector<16x32xbf16>
    %14 = vector.extract_strided_slice %12 {offsets = [0, 128], sizes = [16, 32], strides = [1, 1]} : vector<16x384xbf16> to vector<16x32xbf16>
    %15 = vector.extract_strided_slice %12 {offsets = [0, 256], sizes = [16, 32], strides = [1, 1]} : vector<16x384xbf16> to vector<16x32xbf16>
    %cst_8 = arith.constant dense<0.000000e+00> : vector<16x16xf32>
    %16 = tpu.matmul %13, %14, %cst_8 {dimension_numbers = #tpu.dot_dimension_numbers<[1], [1], [0], [0], [0, 0, 1, 0], [], []>} : vector<16x32xbf16>, vector<16x32xbf16>, vector<16x16xf32> -> vector<16x16xf32>
    %cst_9 = arith.constant 0.176776692 : f32
    %17 = vector.broadcast %cst_9 : f32 to vector<16x16xf32>
    %18 = arith.mulf %16, %17 : vector<16x16xf32>
    %cst_10 = arith.constant dense<0xFF800000> : vector<16xf32>
    %19 = vector.multi_reduction <maximumf>, %18, %cst_10 [1] : vector<16x16xf32> to vector<16xf32>
    %20 = vector.shape_cast %19 : vector<16xf32> to vector<16x1xf32>
    %21 = vector.broadcast %20 : vector<16x1xf32> to vector<16x16xf32>
    %22 = arith.subf %18, %21 : vector<16x16xf32>
    %23 = math.exp %22 : vector<16x16xf32>
    %cst_11 = arith.constant dense<0.000000e+00> : vector<16xf32>
    %24 = vector.multi_reduction <add>, %23, %cst_11 [1] : vector<16x16xf32> to vector<16xf32>
    %25 = vector.shape_cast %24 : vector<16xf32> to vector<16x1xf32>
    %26 = tpu.reciprocal %25 {approx = true} : vector<16x1xf32> -> vector<16x1xf32>
    %27 = vector.broadcast %26 : vector<16x1xf32> to vector<16x16xf32>
    %28 = arith.mulf %23, %27 : vector<16x16xf32>
    %29 = arith.truncf %28 : vector<16x16xf32> to vector<16x16xbf16>
    %cst_12 = arith.constant dense<0.000000e+00> : vector<16x32xf32>
    %30 = tpu.matmul %29, %15, %cst_12 {dimension_numbers = #tpu.dot_dimension_numbers<[1], [0], [0], [1], [0, 0, 1, 1], [], []>} : vector<16x16xbf16>, vector<16x32xbf16>, vector<16x32xf32> -> vector<16x32xf32>
    %31 = arith.truncf %30 : vector<16x32xf32> to vector<16x32xbf16>
    %c0_13 = arith.constant 0 : index
    %c0_14 = arith.constant 0 : index
    %32 = vector.load %arg16[%c0_13, %c0_14] : memref<16x128xbf16, #tpu.memory_space<vmem>>, vector<16x32xbf16>
    tpu.vector_store %arg16[%c0_13, %c0_14], %31 {strides = array<i32>} : memref<16x128xbf16, #tpu.memory_space<vmem>>, vector<16x32xbf16>,
    %33 = vector.extract_strided_slice %12 {offsets = [0, 32], sizes = [16, 32], strides = [1, 1]} : vector<16x384xbf16> to vector<16x32xbf16>
    %34 = vector.extract_strided_slice %12 {offsets = [0, 160], sizes = [16, 32], strides = [1, 1]} : vector<16x384xbf16> to vector<16x32xbf16>
    %35 = vector.extract_strided_slice %12 {offsets = [0, 288], sizes = [16, 32], strides = [1, 1]} : vector<16x384xbf16> to vector<16x32xbf16>
    %cst_15 = arith.constant dense<0.000000e+00> : vector<16x16xf32>
    %36 = tpu.matmul %33, %34, %cst_15 {dimension_numbers = #tpu.dot_dimension_numbers<[1], [1], [0], [0], [0, 0, 1, 0], [], []>} : vector<16x32xbf16>, vector<16x32xbf16>, vector<16x16xf32> -> vector<16x16xf32>
    %cst_16 = arith.constant 0.176776692 : f32
    %37 = vector.broadcast %cst_16 : f32 to vector<16x16xf32>
    %38 = arith.mulf %36, %37 : vector<16x16xf32>
    %cst_17 = arith.constant dense<0xFF800000> : vector<16xf32>
    %39 = vector.multi_reduction <maximumf>, %38, %cst_17 [1] : vector<16x16xf32> to vector<16xf32>
    %40 = vector.shape_cast %39 : vector<16xf32> to vector<16x1xf32>
    %41 = vector.broadcast %40 : vector<16x1xf32> to vector<16x16xf32>
    %42 = arith.subf %38, %41 : vector<16x16xf32>
    %43 = math.exp %42 : vector<16x16xf32>
    %cst_18 = arith.constant dense<0.000000e+00> : vector<16xf32>
    %44 = vector.multi_reduction <add>, %43, %cst_18 [1] : vector<16x16xf32> to vector<16xf32>
    %45 = vector.shape_cast %44 : vector<16xf32> to vector<16x1xf32>
    %46 = tpu.reciprocal %45 {approx = true} : vector<16x1xf32> -> vector<16x1xf32>
    %47 = vector.broadcast %46 : vector<16x1xf32> to vector<16x16xf32>
    %48 = arith.mulf %43, %47 : vector<16x16xf32>
    %49 = arith.truncf %48 : vector<16x16xf32> to vector<16x16xbf16>
    %cst_19 = arith.constant dense<0.000000e+00> : vector<16x32xf32>
    %50 = tpu.matmul %49, %35, %cst_19 {dimension_numbers = #tpu.dot_dimension_numbers<[1], [0], [0], [1], [0, 0, 1, 1], [], []>} : vector<16x16xbf16>, vector<16x32xbf16>, vector<16x32xf32> -> vector<16x32xf32>
    %51 = arith.truncf %50 : vector<16x32xf32> to vector<16x32xbf16>
    %c0_20 = arith.constant 0 : index
    %c32 = arith.constant 32 : index
    %52 = vector.load %arg16[%c0_20, %c32] : memref<16x128xbf16, #tpu.memory_space<vmem>>, vector<16x32xbf16>
    tpu.vector_store %arg16[%c0_20, %c32], %51 {strides = array<i32>} : memref<16x128xbf16, #tpu.memory_space<vmem>>, vector<16x32xbf16>,
    %53 = vector.extract_strided_slice %12 {offsets = [0, 64], sizes = [16, 32], strides = [1, 1]} : vector<16x384xbf16> to vector<16x32xbf16>
    %54 = vector.extract_strided_slice %12 {offsets = [0, 192], sizes = [16, 32], strides = [1, 1]} : vector<16x384xbf16> to vector<16x32xbf16>
    %55 = vector.extract_strided_slice %12 {offsets = [0, 320], sizes = [16, 32], strides = [1, 1]} : vector<16x384xbf16> to vector<16x32xbf16>
    %cst_21 = arith.constant dense<0.000000e+00> : vector<16x16xf32>
    %56 = tpu.matmul %53, %54, %cst_21 {dimension_numbers = #tpu.dot_dimension_numbers<[1], [1], [0], [0], [0, 0, 1, 0], [], []>} : vector<16x32xbf16>, vector<16x32xbf16>, vector<16x16xf32> -> vector<16x16xf32>
    %cst_22 = arith.constant 0.176776692 : f32
    %57 = vector.broadcast %cst_22 : f32 to vector<16x16xf32>
    %58 = arith.mulf %56, %57 : vector<16x16xf32>
    %cst_23 = arith.constant dense<0xFF800000> : vector<16xf32>
    %59 = vector.multi_reduction <maximumf>, %58, %cst_23 [1] : vector<16x16xf32> to vector<16xf32>
    %60 = vector.shape_cast %59 : vector<16xf32> to vector<16x1xf32>
    %61 = vector.broadcast %60 : vector<16x1xf32> to vector<16x16xf32>
    %62 = arith.subf %58, %61 : vector<16x16xf32>
    %63 = math.exp %62 : vector<16x16xf32>
    %cst_24 = arith.constant dense<0.000000e+00> : vector<16xf32>
    %64 = vector.multi_reduction <add>, %63, %cst_24 [1] : vector<16x16xf32> to vector<16xf32>
    %65 = vector.shape_cast %64 : vector<16xf32> to vector<16x1xf32>
    %66 = tpu.reciprocal %65 {approx = true} : vector<16x1xf32> -> vector<16x1xf32>
    %67 = vector.broadcast %66 : vector<16x1xf32> to vector<16x16xf32>
    %68 = arith.mulf %63, %67 : vector<16x16xf32>
    %69 = arith.truncf %68 : vector<16x16xf32> to vector<16x16xbf16>
    %cst_25 = arith.constant dense<0.000000e+00> : vector<16x32xf32>
    %70 = tpu.matmul %69, %55, %cst_25 {dimension_numbers = #tpu.dot_dimension_numbers<[1], [0], [0], [1], [0, 0, 1, 1], [], []>} : vector<16x16xbf16>, vector<16x32xbf16>, vector<16x32xf32> -> vector<16x32xf32>
    %71 = arith.truncf %70 : vector<16x32xf32> to vector<16x32xbf16>
    %c0_26 = arith.constant 0 : index
    %c64 = arith.constant 64 : index
    %72 = vector.load %arg16[%c0_26, %c64] : memref<16x128xbf16, #tpu.memory_space<vmem>>, vector<16x32xbf16>
    tpu.vector_store %arg16[%c0_26, %c64], %71 {strides = array<i32>} : memref<16x128xbf16, #tpu.memory_space<vmem>>, vector<16x32xbf16>,
    %73 = vector.extract_strided_slice %12 {offsets = [0, 96], sizes = [16, 32], strides = [1, 1]} : vector<16x384xbf16> to vector<16x32xbf16>
    %74 = vector.extract_strided_slice %12 {offsets = [0, 224], sizes = [16, 32], strides = [1, 1]} : vector<16x384xbf16> to vector<16x32xbf16>
    %75 = vector.extract_strided_slice %12 {offsets = [0, 352], sizes = [16, 32], strides = [1, 1]} : vector<16x384xbf16> to vector<16x32xbf16>
    %cst_27 = arith.constant dense<0.000000e+00> : vector<16x16xf32>
    %76 = tpu.matmul %73, %74, %cst_27 {dimension_numbers = #tpu.dot_dimension_numbers<[1], [1], [0], [0], [0, 0, 1, 0], [], []>} : vector<16x32xbf16>, vector<16x32xbf16>, vector<16x16xf32> -> vector<16x16xf32>
    %cst_28 = arith.constant 0.176776692 : f32
    %77 = vector.broadcast %cst_28 : f32 to vector<16x16xf32>
    %78 = arith.mulf %76, %77 : vector<16x16xf32>
    %cst_29 = arith.constant dense<0xFF800000> : vector<16xf32>
    %79 = vector.multi_reduction <maximumf>, %78, %cst_29 [1] : vector<16x16xf32> to vector<16xf32>
    %80 = vector.shape_cast %79 : vector<16xf32> to vector<16x1xf32>
    %81 = vector.broadcast %80 : vector<16x1xf32> to vector<16x16xf32>
    %82 = arith.subf %78, %81 : vector<16x16xf32>
    %83 = math.exp %82 : vector<16x16xf32>
    %cst_30 = arith.constant dense<0.000000e+00> : vector<16xf32>
    %84 = vector.multi_reduction <add>, %83, %cst_30 [1] : vector<16x16xf32> to vector<16xf32>
    %85 = vector.shape_cast %84 : vector<16xf32> to vector<16x1xf32>
    %86 = tpu.reciprocal %85 {approx = true} : vector<16x1xf32> -> vector<16x1xf32>
    %87 = vector.broadcast %86 : vector<16x1xf32> to vector<16x16xf32>
    %88 = arith.mulf %83, %87 : vector<16x16xf32>
    %89 = arith.truncf %88 : vector<16x16xf32> to vector<16x16xbf16>
    %cst_31 = arith.constant dense<0.000000e+00> : vector<16x32xf32>
    %90 = tpu.matmul %89, %75, %cst_31 {dimension_numbers = #tpu.dot_dimension_numbers<[1], [0], [0], [1], [0, 0, 1, 1], [], []>} : vector<16x16xbf16>, vector<16x32xbf16>, vector<16x32xf32> -> vector<16x32xf32>
    %91 = arith.truncf %90 : vector<16x32xf32> to vector<16x32xbf16>
    %c0_32 = arith.constant 0 : index
    %c96 = arith.constant 96 : index
    %92 = vector.load %arg16[%c0_32, %c96] : memref<16x128xbf16, #tpu.memory_space<vmem>>, vector<16x32xbf16>
    tpu.vector_store %arg16[%c0_32, %c96], %91 {strides = array<i32>} : memref<16x128xbf16, #tpu.memory_space<vmem>>, vector<16x32xbf16>,
    %c0_33 = arith.constant 0 : index
    %c0_34 = arith.constant 0 : index
    %93 = vector.load %arg16[%c0_33, %c0_34] : memref<16x128xbf16, #tpu.memory_space<vmem>>, vector<16x128xbf16>
    %c0_35 = arith.constant 0 : index
    %c0_36 = arith.constant 0 : index
    %c0_37 = arith.constant 0 : index
    %94 = vector.load %arg9[%c0_35, %c0_36, %c0_37] : memref<1x128x128xbf16, #tpu.memory_space<vmem>>, vector<1x128x128xbf16>
    %95 = vector.shape_cast %94 : vector<1x128x128xbf16> to vector<128x128xbf16>
    %cst_38 = arith.constant dense<0.000000e+00> : vector<16x128xf32>
    %96 = tpu.matmul %93, %95, %cst_38 {dimension_numbers = #tpu.dot_dimension_numbers<[1], [0], [0], [1], [0, 0, 1, 1], [], []>} : vector<16x128xbf16>, vector<128x128xbf16>, vector<16x128xf32> -> vector<16x128xf32>
    %c0_39 = arith.constant 0 : index
    %c0_40 = arith.constant 0 : index
    %c0_41 = arith.constant 0 : index
    %97 = vector.load %arg13[%c0_39, %c0_40, %c0_41] : memref<1x8x128xf32, #tpu.memory_space<vmem>>, vector<1x1x128xf32>
    %98 = vector.shape_cast %97 : vector<1x1x128xf32> to vector<1x128xf32>
    %99 = vector.broadcast %98 : vector<1x128xf32> to vector<16x128xf32>
    %100 = arith.addf %96, %99 : vector<16x128xf32>
    %101 = arith.addf %3, %100 : vector<16x128xf32>
    %c0_42 = arith.constant 0 : index
    %c1 = arith.constant 1 : index
    %c0_43 = arith.constant 0 : index
    %102 = vector.load %arg13[%c0_42, %c1, %c0_43] : memref<1x8x128xf32, #tpu.memory_space<vmem>>, vector<1x1x128xf32>
    %103 = vector.shape_cast %102 : vector<1x1x128xf32> to vector<1x128xf32>
    %c0_44 = arith.constant 0 : index
    %c2 = arith.constant 2 : index
    %c0_45 = arith.constant 0 : index
    %104 = vector.load %arg13[%c0_44, %c2, %c0_45] : memref<1x8x128xf32, #tpu.memory_space<vmem>>, vector<1x1x128xf32>
    %105 = vector.shape_cast %104 : vector<1x1x128xf32> to vector<1x128xf32>
    %cst_46 = arith.constant dense<0.000000e+00> : vector<16xf32>
    %106 = vector.multi_reduction <add>, %101, %cst_46 [1] : vector<16x128xf32> to vector<16xf32>
    %107 = vector.shape_cast %106 : vector<16xf32> to vector<16x1xf32>
    %cst_47 = arith.constant 1.280000e+02 : f32
    %108 = vector.broadcast %cst_47 : f32 to vector<16x1xf32>
    %109 = arith.divf %107, %108 : vector<16x1xf32>
    %110 = vector.broadcast %109 : vector<16x1xf32> to vector<16x128xf32>
    %111 = arith.subf %101, %110 : vector<16x128xf32>
    %112 = arith.mulf %111, %111 : vector<16x128xf32>
    %cst_48 = arith.constant dense<0.000000e+00> : vector<16xf32>
    %113 = vector.multi_reduction <add>, %112, %cst_48 [1] : vector<16x128xf32> to vector<16xf32>
    %114 = vector.shape_cast %113 : vector<16xf32> to vector<16x1xf32>
    %cst_49 = arith.constant 1.280000e+02 : f32
    %115 = vector.broadcast %cst_49 : f32 to vector<16x1xf32>
    %116 = arith.divf %114, %115 : vector<16x1xf32>
    %117 = vector.broadcast %109 : vector<16x1xf32> to vector<16x128xf32>
    %118 = arith.subf %101, %117 : vector<16x128xf32>
    %cst_50 = arith.constant 9.99999996E-13 : f32
    %119 = vector.broadcast %cst_50 : f32 to vector<16x1xf32>
    %120 = arith.addf %116, %119 : vector<16x1xf32>
    %121 = math.rsqrt %120 : vector<16x1xf32>
    %122 = vector.broadcast %121 : vector<16x1xf32> to vector<16x128xf32>
    %123 = arith.mulf %118, %122 : vector<16x128xf32>
    %124 = vector.broadcast %103 : vector<1x128xf32> to vector<16x128xf32>
    %125 = arith.mulf %123, %124 : vector<16x128xf32>
    %126 = vector.broadcast %105 : vector<1x128xf32> to vector<16x128xf32>
    %127 = arith.addf %125, %126 : vector<16x128xf32>
    %128 = arith.truncf %127 : vector<16x128xf32> to vector<16x128xbf16>
    %c0_51 = arith.constant 0 : index
    %c0_52 = arith.constant 0 : index
    %c0_53 = arith.constant 0 : index
    %129 = vector.load %arg10[%c0_51, %c0_52, %c0_53] : memref<1x128x256xbf16, #tpu.memory_space<vmem>>, vector<1x128x256xbf16>
    %130 = vector.shape_cast %129 : vector<1x128x256xbf16> to vector<128x256xbf16>
    %cst_54 = arith.constant dense<0.000000e+00> : vector<16x256xf32>
    %131 = tpu.matmul %128, %130, %cst_54 {dimension_numbers = #tpu.dot_dimension_numbers<[1], [0], [0], [1], [0, 0, 1, 1], [], []>} : vector<16x128xbf16>, vector<128x256xbf16>, vector<16x256xf32> -> vector<16x256xf32>
    %c0_55 = arith.constant 0 : index
    %c0_56 = arith.constant 0 : index
    %c0_57 = arith.constant 0 : index
    %132 = vector.load %arg11[%c0_55, %c0_56, %c0_57] : memref<1x1x256xf32, #tpu.memory_space<vmem>>, vector<1x1x256xf32>
    %133 = vector.shape_cast %132 : vector<1x1x256xf32> to vector<1x256xf32>
    %134 = vector.broadcast %133 : vector<1x256xf32> to vector<16x256xf32>
    %135 = arith.addf %131, %134 : vector<16x256xf32>
    %136 = arith.mulf %135, %135 : vector<16x256xf32>
    %137 = arith.mulf %135, %136 : vector<16x256xf32>
    %cst_58 = arith.constant 4.471500e-02 : f32
    %138 = vector.broadcast %cst_58 : f32 to vector<16x256xf32>
    %139 = arith.mulf %138, %137 : vector<16x256xf32>
    %140 = arith.addf %135, %139 : vector<16x256xf32>
    %cst_59 = arith.constant 0.797884583 : f32
    %141 = vector.broadcast %cst_59 : f32 to vector<16x256xf32>
    %142 = arith.mulf %141, %140 : vector<16x256xf32>
    %143 = math.tanh %142 : vector<16x256xf32>
    %cst_60 = arith.constant 1.000000e+00 : f32
    %144 = vector.broadcast %cst_60 : f32 to vector<16x256xf32>
    %145 = arith.addf %144, %143 : vector<16x256xf32>
    %cst_61 = arith.constant 5.000000e-01 : f32
    %146 = vector.broadcast %cst_61 : f32 to vector<16x256xf32>
    %147 = arith.mulf %146, %145 : vector<16x256xf32>
    %148 = arith.mulf %135, %147 : vector<16x256xf32>
    %149 = arith.truncf %148 : vector<16x256xf32> to vector<16x256xbf16>
    %c0_62 = arith.constant 0 : index
    %c0_63 = arith.constant 0 : index
    %c0_64 = arith.constant 0 : index
    %150 = vector.load %arg12[%c0_62, %c0_63, %c0_64] : memref<1x256x128xbf16, #tpu.memory_space<vmem>>, vector<1x256x128xbf16>
    %151 = vector.shape_cast %150 : vector<1x256x128xbf16> to vector<256x128xbf16>
    %cst_65 = arith.constant dense<0.000000e+00> : vector<16x128xf32>
    %152 = tpu.matmul %149, %151, %cst_65 {dimension_numbers = #tpu.dot_dimension_numbers<[1], [0], [0], [1], [0, 0, 1, 1], [], []>} : vector<16x256xbf16>, vector<256x128xbf16>, vector<16x128xf32> -> vector<16x128xf32>
    %c0_66 = arith.constant 0 : index
    %c3 = arith.constant 3 : index
    %c0_67 = arith.constant 0 : index
    %153 = vector.load %arg13[%c0_66, %c3, %c0_67] : memref<1x8x128xf32, #tpu.memory_space<vmem>>, vector<1x1x128xf32>
    %154 = vector.shape_cast %153 : vector<1x1x128xf32> to vector<1x128xf32>
    %155 = vector.broadcast %154 : vector<1x128xf32> to vector<16x128xf32>
    %156 = arith.addf %152, %155 : vector<16x128xf32>
    %157 = arith.addf %127, %156 : vector<16x128xf32>
    %c0_68 = arith.constant 0 : index
    %c4 = arith.constant 4 : index
    %c0_69 = arith.constant 0 : index
    %158 = vector.load %arg13[%c0_68, %c4, %c0_69] : memref<1x8x128xf32, #tpu.memory_space<vmem>>, vector<1x1x128xf32>
    %159 = vector.shape_cast %158 : vector<1x1x128xf32> to vector<1x128xf32>
    %c0_70 = arith.constant 0 : index
    %c5 = arith.constant 5 : index
    %c0_71 = arith.constant 0 : index
    %160 = vector.load %arg13[%c0_70, %c5, %c0_71] : memref<1x8x128xf32, #tpu.memory_space<vmem>>, vector<1x1x128xf32>
    %161 = vector.shape_cast %160 : vector<1x1x128xf32> to vector<1x128xf32>
    %cst_72 = arith.constant dense<0.000000e+00> : vector<16xf32>
    %162 = vector.multi_reduction <add>, %157, %cst_72 [1] : vector<16x128xf32> to vector<16xf32>
    %163 = vector.shape_cast %162 : vector<16xf32> to vector<16x1xf32>
    %cst_73 = arith.constant 1.280000e+02 : f32
    %164 = vector.broadcast %cst_73 : f32 to vector<16x1xf32>
    %165 = arith.divf %163, %164 : vector<16x1xf32>
    %166 = vector.broadcast %165 : vector<16x1xf32> to vector<16x128xf32>
    %167 = arith.subf %157, %166 : vector<16x128xf32>
    %168 = arith.mulf %167, %167 : vector<16x128xf32>
    %cst_74 = arith.constant dense<0.000000e+00> : vector<16xf32>
    %169 = vector.multi_reduction <add>, %168, %cst_74 [1] : vector<16x128xf32> to vector<16xf32>
    %170 = vector.shape_cast %169 : vector<16xf32> to vector<16x1xf32>
    %cst_75 = arith.constant 1.280000e+02 : f32
    %171 = vector.broadcast %cst_75 : f32 to vector<16x1xf32>
    %172 = arith.divf %170, %171 : vector<16x1xf32>
    %173 = vector.broadcast %165 : vector<16x1xf32> to vector<16x128xf32>
    %174 = arith.subf %157, %173 : vector<16x128xf32>
    %cst_76 = arith.constant 9.99999996E-13 : f32
    %175 = vector.broadcast %cst_76 : f32 to vector<16x1xf32>
    %176 = arith.addf %172, %175 : vector<16x1xf32>
    %177 = math.rsqrt %176 : vector<16x1xf32>
    %178 = vector.broadcast %177 : vector<16x1xf32> to vector<16x128xf32>
    %179 = arith.mulf %174, %178 : vector<16x128xf32>
    %180 = vector.broadcast %159 : vector<1x128xf32> to vector<16x128xf32>
    %181 = arith.mulf %179, %180 : vector<16x128xf32>
    %182 = vector.broadcast %161 : vector<1x128xf32> to vector<16x128xf32>
    %183 = arith.addf %181, %182 : vector<16x128xf32>
    %c0_77 = arith.constant 0 : index
    %c0_78 = arith.constant 0 : index
    %184 = vector.load %arg15[%c0_77, %c0_78] : memref<16x128xf32, #tpu.memory_space<vmem>>, vector<16x128xf32>
    tpu.vector_store %arg15[%c0_77, %c0_78], %183 {strides = array<i32>} : memref<16x128xf32, #tpu.memory_space<vmem>>, vector<16x128xf32>,
    %c1_i32 = arith.constant 1 : i32
    %185 = arith.cmpi eq, %arg0, %c1_i32 : i32
    %186 = arith.extui %185 : i1 to i32
    %c0_i32_79 = arith.constant 0 : i32
    %187 = arith.cmpi ne, %186, %c0_i32_79 : i32
    scf.if %187 {
      %188 = vector.extract_strided_slice %183 {offsets = [0, 0], sizes = [8, 128], strides = [1, 1]} : vector<16x128xf32> to vector<8x128xf32>
      %c0_80 = arith.constant 0 : index
      %c0_81 = arith.constant 0 : index
      %189 = vector.load %arg14[%c0_80, %c0_81] : memref<8x128xf32, #tpu.memory_space<vmem>>, vector<8x128xf32>
      tpu.vector_store %arg14[%c0_80, %c0_81], %188 {strides = array<i32>} : memref<8x128xf32, #tpu.memory_space<vmem>>, vector<8x128xf32>,
    } else {
    }
    return
  }
  func.func @transform_0(%arg0: i32) -> (i32, i32) {
    %c0_i32 = arith.constant 0 : i32
    %c0_i32_0 = arith.constant 0 : i32
    %c0_i32_1 = arith.constant 0 : i32
    return %c0_i32, %c0_i32_0 : i32, i32
  }
  func.func @transform_1(%arg0: i32) -> (i32, i32) {
    %c0_i32 = arith.constant 0 : i32
    %c0_i32_0 = arith.constant 0 : i32
    %c0_i32_1 = arith.constant 0 : i32
    return %c0_i32, %c0_i32_0 : i32, i32
  }
  func.func @transform_2(%arg0: i32) -> (i32, i32) {
    %c0_i32 = arith.constant 0 : i32
    %c0_i32_0 = arith.constant 0 : i32
    %c0_i32_1 = arith.constant 0 : i32
    return %c0_i32, %c0_i32_0 : i32, i32
  }
  func.func @transform_3(%arg0: i32) -> (i32, i32) {
    %c0_i32 = arith.constant 0 : i32
    %c0_i32_0 = arith.constant 0 : i32
    %c0_i32_1 = arith.constant 0 : i32
    return %c0_i32, %c0_i32_0 : i32, i32
  }
  func.func @transform_4(%arg0: i32) -> (i32, i32) {
    %c0_i32 = arith.constant 0 : i32
    %c0_i32_0 = arith.constant 0 : i32
    %c0_i32_1 = arith.constant 0 : i32
    return %c0_i32, %c0_i32_0 : i32, i32
  }
  func.func @transform_5(%arg0: i32) -> (i32, i32) {
    %c0_i32 = arith.constant 0 : i32
    %c0_i32_0 = arith.constant 0 : i32
    %c0_i32_1 = arith.constant 0 : i32
    return %c0_i32, %c0_i32_0 : i32, i32
  }
  func.func @transform_6(%arg0: i32) -> (i32, i32, i32) {
    %c0_i32 = arith.constant 0 : i32
    %c0_i32_0 = arith.constant 0 : i32
    %c0_i32_1 = arith.constant 0 : i32
    return %arg0, %c0_i32, %c0_i32_0 : i32, i32, i32
  }
  func.func @transform_7(%arg0: i32) -> (i32, i32, i32) {
    %c0_i32 = arith.constant 0 : i32
    %c0_i32_0 = arith.constant 0 : i32
    %c0_i32_1 = arith.constant 0 : i32
    return %arg0, %c0_i32, %c0_i32_0 : i32, i32, i32
  }
  func.func @transform_8(%arg0: i32) -> (i32, i32, i32) {
    %c0_i32 = arith.constant 0 : i32
    %c0_i32_0 = arith.constant 0 : i32
    %c0_i32_1 = arith.constant 0 : i32
    return %arg0, %c0_i32, %c0_i32_0 : i32, i32, i32
  }
  func.func @transform_9(%arg0: i32) -> (i32, i32, i32) {
    %c0_i32 = arith.constant 0 : i32
    %c0_i32_0 = arith.constant 0 : i32
    %c0_i32_1 = arith.constant 0 : i32
    return %arg0, %c0_i32, %c0_i32_0 : i32, i32, i32
  }
  func.func @transform_10(%arg0: i32) -> (i32, i32, i32) {
    %c0_i32 = arith.constant 0 : i32
    %c0_i32_0 = arith.constant 0 : i32
    %c0_i32_1 = arith.constant 0 : i32
    return %arg0, %c0_i32, %c0_i32_0 : i32, i32, i32
  }
  func.func @transform_11(%arg0: i32) -> (i32, i32, i32) {
    %c0_i32 = arith.constant 0 : i32
    %c0_i32_0 = arith.constant 0 : i32
    %c0_i32_1 = arith.constant 0 : i32
    return %arg0, %c0_i32, %c0_i32_0 : i32, i32, i32
  }
  func.func @transform_12(%arg0: i32) -> (i32, i32, i32) {
    %c0_i32 = arith.constant 0 : i32
    %c0_i32_0 = arith.constant 0 : i32
    %c0_i32_1 = arith.constant 0 : i32
    return %arg0, %c0_i32, %c0_i32_0 : i32, i32, i32
  }
  func.func @transform_13(%arg0: i32) -> (i32, i32) {
    %c0_i32 = arith.constant 0 : i32
    %c0_i32_0 = arith.constant 0 : i32
    %c0_i32_1 = arith.constant 0 : i32
    return %c0_i32, %c0_i32_0 : i32, i32
  }
}

</mosaic_0001>

<bundles_post_ra>
// kernel: tpu_custom_call.1
= control target key start
LH: loop header
LB: loop body
LE: loop exit
PB: predicated region body
PF: predicated region fallthrough
CT: control target
= control target key end

     0   :  { %s3897_s0 = inlined_call_operand.vmem [shape: s32[16,1], index: 0, kind: input, shape index: {}]   ;;  %s3898_s1 = inlined_call_operand.vmem [shape: s32[16,1], index: 1, kind: input, shape index: {}]   ;;  %s3899_s2 = inlined_call_operand.hbm [shape: f32[128,128], index: 2, kind: input, shape index: {}]   ;;  %s3900_s3 = inlined_call_operand.vmem [shape: f32[16,128], index: 3, kind: input, shape index: {}]   ;;  %s3901_s4 = inlined_call_operand.hbm [shape: f32[2,128], index: 4, kind: input, shape index: {}]   ;;  %s3902_s5 = inlined_call_operand.hbm [shape: f32[2,128], index: 5, kind: input, shape index: {}]   ;;  %s3903_s6 = inlined_call_operand.hbm [shape: bf16[2,128,384], index: 6, kind: input, shape index: {}]   ;;  %s3904_s7 = inlined_call_operand.vmem [shape: f32[2,1,384], index: 7, kind: input, shape index: {}]   ;;  %s3905_s8 = inlined_call_operand.hbm [shape: bf16[2,128,128], index: 8, kind: input, shape index: {}]   ;;  %s3906_s9 = inlined_call_operand.hbm [shape: bf16[2,128,256], index: 9, kind: input, shape index: {}]   ;;  %s3907_s10 = inlined_call_operand.vmem [shape: f32[2,1,256], index: 10, kind: input, shape index: {}]   ;;  %s3908_s11 = inlined_call_operand.hbm [shape: bf16[2,256,128], index: 11, kind: input, shape index: {}]   ;;  %s3909_s12 = inlined_call_operand.vmem [shape: f32[2,8,128], index: 12, kind: input, shape index: {}]   ;;  %s3910_s13 = inlined_call_operand.hbm [shape: f32[8,128], index: 13, kind: output, shape index: {}]  }
   0x1   :  { %3923 = sst [smem:[#allocation25_spill]] %s3897_s0 }
   0x2   :  { %3924 = sst [smem:[#allocation26_spill]] %s3898_s1 }
   0x3   :  { %3925 = sst [smem:[#allocation27_spill]] %s3900_s3 }
   0x4   :  { %3926 = sst [smem:[#allocation28_spill]] %s3901_s4 }
   0x5   :  { %3927 = sst [smem:[#allocation29_spill]] %s3903_s6 }
   0x6   :  { %3928 = sst [smem:[#allocation30_spill]] %s3904_s7 }
   0x7   :  { %3929 = sst [smem:[#allocation31_spill]] %s3906_s9 }
   0x8   :  { %3930 = sst [smem:[#allocation32_spill]] %s3907_s10 }
   0x9   :  { %3931 = sst [smem:[#allocation33_spill]] %s3909_s12 }
   0xa   :  { %3932 = sst [smem:[#allocation34_spill]] %s3910_s13 }
   0xb   :  { %18 = vsyncpa [#allocation5], 0 }
   0xc   :  { %19 = vsyncpa [#allocation8], 0 }
   0xd   :  { %20 = vsyncpa [#allocation11], 0 }
   0xe   :  { %22 = vsyncpa [#allocation11 + $0x1], 0 }
   0xf   :  { %23 = vsyncpa [#allocation14], 0 }
  0x10   :  { %25 = vsyncpa [#allocation14 + $0x1], 0 }
  0x11   :  { %26 = vsyncpa [#allocation6], 0  ;;  %s3365_s25 = smov 0   ;;  %s3367_s26 = smov 0  }
  0x12   :  { %s3369_s27 = smov 0   ;;  %s3371_s28 = smov 0  }
  0x13 LB: > { %3933 = sst [smem:[#allocation22_spill]] %s3266_s27  ;;  %s3384_s29 = sadd.s32 4294967295, %s3270_s28   ;;  %s3270_s28 = sphi %s3371_s28, %s3964_s28   ;;  %s3266_s27 = sphi %s3369_s27, %s3966_s27   ;;  %s3262_s26 = sphi %s3367_s26, %s3968_s26   ;;  %s3258_s25 = sphi %s3365_s25, %s3967_s25  }
  0x14   : > { %s3387_s30 = sadd.s32 1, %s3270_s28   ;;  %s165_s15 = sadd.s32 1, %s3266_s27 }
  0x15   : > { %3934 = sst [smem:[#allocation23_spill]] %s3387_s30  ;;  %s162_s14 = ssub.s32 %s3270_s28, %s3387_s30 }
  0x16   : > { %p163_p0 = scmp.eq.s32.totalorder %s162_s14, 0  ;;  %p172_p1 = scmp.ne.s32.totalorder %s3266_s27, %s3262_s26 }
  0x17   : > { %p173_p2 = scmp.eq.s32.totalorder %s3270_s28, 0  ;;  %p178_p3 = scmp.ne.s32.totalorder %s3262_s26, %s3258_s25 }
  0x18   : > { %s3397_s16 = scalar_select %p163_p0, %s3266_s27, %s165_s15  }
  0x19   : > { %p3399_p4 = por %p173_p2, %p172_p1  ;;  %p3915_p5 = scmp.eq.s32.totalorder %s3384_s29, 0 }
  0x1a   : > { %3935 = sst [smem:[#allocation24_spill]] %s3397_s16  ;;  %p2420_p6 = scmp.ge.s32.totalorder %s3270_s28, 1 }
  0x1b   : > { %p366_p7 = scmp.lt.s32.totalorder %s3270_s28, 3  ;;  %p3408_p8 = por %p3915_p5, %p178_p3 }
  0x1c   : > { %s3272_s20 = smov [#allocation7]   ;;  %p2809_p12 = scmp.lt.s32.totalorder %s3270_s28, 2 }
  0x1d   : > { %s3937_s18 = scalar_select %p3408_p8, 1, 0 }
  0x1e   : > { %p3413_p10 = pnand %p2420_p6, %p366_p7  ;;  %s401_s21 = sshll.u32 %s3272_s20, 4  ;;  %s402_s21 = int_to_ptr.vmem [resolvable:$true] %s401_s21 }
  0x1f   : > { %s3428_s24 = sand.u32 1, %s3266_s27   ;;  %s2756_s25 = smul.u32 3072, %s3270_s28 }
  0x20   : > { %s3938_s19 = scalar_select %p3413_p10, 1, 0 }
  0x21   : > { %p2783_p11 = pneg %p3413_p10  ;;  %s2755_s14 = smul.u32 192, %s3428_s24 }
  0x22   : > { %s3017_s15 = scalar_lea.vmem %s402_s21, 32  ;;  %p3025_p6 = scmp.lt.s32.totalorder %s402_s21, %s402_s21 }
  0x23   : > { %p3423_p13 = pnand %p2783_p11, %p3915_p5  ;;  %p3018_p1 = scmp.ne.s32.totalorder %s402_s21, %s3017_s15 }
  0x24   : > { %p3026_p7 = scmp.lt.s32.totalorder %s3017_s15, %s3017_s15 }
  0x25   : > { %s3939_s23 = scalar_select %p3423_p13, 1, 0 }
  0x26   : > { %p3916_p0 = pneg %p3423_p13  ;;  %p3027_p11 = por %p3026_p7, %p3025_p6 }
  0x28   : > { %p3020_p2 = pnand %p3018_p1, %p3916_p0 }
  0x2a   : > { %p3021_p3 = pneg %p3020_p2 }
  0x2c   : > { %p3028_p9 = pnand %p3027_p11, %p3021_p3 }
  0x2e   : > { %3031 = shalt.err (!%p3028_p9)
}
  0x2f   : > { %s3940_s4 = sld [smem:[#allocation28_spill]]  ;;  %s427_s15 = scalar_lea.vmem [#allocation10], %s2755_s14 }
  0x30   : > { %s3941_s6 = sld [smem:[#allocation29_spill]]  ;;  %s434_s13 = sshll.u32 %s427_s15, 4  ;;  %s3455_s13 = int_to_ptr.vmem [resolvable:$true] %s434_s13 }
  0x31   : > { %p3451_p9 = pnand %p2809_p12, %p3399_p4 }
  0x33   : > { %p3465_p2 = pneg %p3451_p9 }
  0x35   : > { %2789 = dma.hbm_to_vmem [thread:$0]  (!%p3423_p13), %s3940_s4, 32, %s402_s21, [#allocation8]  }
  0x36   : > { %s3445_s30 = scalar_lea.hbm %s3941_s6, %s2756_s25  ;;  %s3943_s21 = sand.u32 1, %s3270_s28  }
  0x37   : > { %s3459_s22 = scalar_lea.sflag [#allocation11], %s3943_s21  ;;  %s3032_s27 = scalar_lea.hbm %s3445_s30, 3072 }
  0x38   : > { %p3033_p1 = scmp.ne.s32.totalorder %s3445_s30, %s3032_s27  ;;  %s3037_s14 = scalar_lea.hbm %s3941_s6, 6144 }
  0x39   : > { %p3038_p12 = scmp.lt.s32.totalorder %s3445_s30, %s3941_s6  ;;  %p3039_p6 = scmp.lt.s32.totalorder %s3037_s14, %s3032_s27 }
  0x3a   : > { %p3035_p3 = pnand %p3465_p2, %p3033_p1 }
  0x3b   : > { %p3040_p7 = por %p3039_p6, %p3038_p12 }
  0x3c   : > { %p3036_p4 = pneg %p3035_p3 }
  0x3e   : > { %p3041_p11 = pnand %p3040_p7, %p3036_p4 }
  0x40   : > { %3044 = shalt.err (!%p3041_p11)
}
  0x41   : > { %s3045_s21 = scalar_lea.vmem %s3455_s13, 3072  ;;  %s3273_s4 = smov [#allocation10]  }
  0x42   : > { %p3046_p5 = scmp.ne.s32.totalorder %s3455_s13, %s3045_s21  ;;  %s3050_s17 = sshll.u32 %s3273_s4, 4  ;;  %s3051_s17 = int_to_ptr.vmem [resolvable:$false] %s3050_s17 }
  0x43   : > { %s3052_s25 = scalar_lea.vmem %s3051_s17, 6144  ;;  %p3053_p0 = scmp.lt.s32.totalorder %s3455_s13, %s3051_s17 }
  0x44   : > { %p3048_p1 = pnand %p3046_p5, %p3465_p2  ;;  %p3054_p8 = scmp.lt.s32.totalorder %s3052_s25, %s3045_s21 }
  0x46   : > { %p3049_p3 = pneg %p3048_p1  ;;  %p3055_p10 = por %p3054_p8, %p3053_p0 }
  0x48   : > { %p3056_p13 = pnand %p3055_p10, %p3049_p3 }
  0x4a   : > { %3059 = shalt.err (!%p3056_p13)
}
  0x4b   : > { %s3274_s27 = smov 192   ;;  %s3275_s14 = smov 12  }
  0x4c   : > { %2796 = dma.hbm_to_vmem [thread:$0]  (!%p3451_p9), %s3445_s30, 3072, %s3455_s13, %s3459_s22, %s3274_s27, %s3274_s27, %s3275_s14  }
  0x4d   : > { %s2429_s4 = sshll.u32 %s3428_s24, 7  ;;  %s2548_s20 = sshll.u32 %s3270_s28, 11 }
  0x4e   : > { %s3945_s9 = sld [smem:[#allocation31_spill]]  ;;  %s476_s25 = scalar_lea.vmem [#allocation13], %s2429_s4 }
  0x4f   : > { %s483_s6 = sshll.u32 %s476_s25, 4  ;;  %s3946_s1 = sand.u32 1, %s3270_s28   ;;  %s3499_s6 = int_to_ptr.vmem [resolvable:$true] %s483_s6 }
  0x50   : > { %s3503_s0 = scalar_lea.sflag [#allocation14], %s3946_s1 }
  0x54   : > { %s3495_s17 = scalar_lea.hbm %s3945_s9, %s2548_s20  ;;  %s3065_s14 = scalar_lea.hbm %s3945_s9, 4096 }
  0x55   : > { %s3060_s13 = scalar_lea.hbm %s3495_s17, 2048  ;;  %p3066_p13 = scmp.lt.s32.totalorder %s3495_s17, %s3945_s9 }
  0x56   : > { %p3061_p5 = scmp.ne.s32.totalorder %s3495_s17, %s3060_s13  ;;  %p3067_p0 = scmp.lt.s32.totalorder %s3065_s14, %s3060_s13 }
  0x58   : > { %p3063_p8 = pnand %p3061_p5, %p3465_p2  ;;  %p3068_p4 = por %p3067_p0, %p3066_p13 }
  0x5a   : > { %p3064_p10 = pneg %p3063_p8 }
  0x5c   : > { %p3069_p12 = pnand %p3068_p4, %p3064_p10 }
  0x5e   : > { %3072 = shalt.err (!%p3069_p12)
}
  0x5f   : > { %s3073_s1 = scalar_lea.vmem %s3499_s6, 2048  ;;  %s3276_s25 = smov [#allocation13]  }
  0x60   : > { %p3074_p6 = scmp.ne.s32.totalorder %s3499_s6, %s3073_s1  ;;  %s3078_s30 = sshll.u32 %s3276_s25, 4  ;;  %s3079_s30 = int_to_ptr.vmem [resolvable:$false] %s3078_s30 }
  0x61   : > { %s3080_s27 = scalar_lea.vmem %s3079_s30, 4096  ;;  %p3081_p1 = scmp.lt.s32.totalorder %s3499_s6, %s3079_s30 }
  0x62   : > { %p3076_p7 = pnand %p3074_p6, %p3465_p2  ;;  %p3082_p3 = scmp.lt.s32.totalorder %s3080_s27, %s3073_s1 }
  0x64   : > { %p3077_p11 = pneg %p3076_p7  ;;  %p3083_p5 = por %p3082_p3, %p3081_p1 }
  0x66   : > { %p3084_p8 = pnand %p3083_p5, %p3077_p11 }
  0x68   : > { %3087 = shalt.err (!%p3084_p8)
}
  0x69   : > { %s3277_s13 = smov 128   ;;  %s3278_s14 = smov 8  }
  0x6a   : > { %2802 = dma.hbm_to_vmem [thread:$0]  (!%p3451_p9), %s3495_s17, 2048, %s3499_s6, %s3503_s0, %s3277_s13, %s3277_s13, %s3278_s14  }
  0x6b   : > { %s3531_s25 = scalar_lea.hbm %s3908_s11, %s2548_s20  ;;  %s504_s1 = scalar_lea.vmem [#allocation15], %s2429_s4 }
  0x6c   : > { %s511_s30 = sshll.u32 %s504_s1, 4  ;;  %s3279_s27 = smov [#allocation4]   ;;  %s3535_s30 = int_to_ptr.vmem [resolvable:$true] %s511_s30 }
  0x6d   : > { %s384_s9 = sshll.u32 %s3279_s27, 4  ;;  %s3280_s12 = smov [#allocation9]   ;;  %s385_s9 = int_to_ptr.vmem [resolvable:$true] %s384_s9 }
  0x6e   : > { %s412_s7 = sshll.u32 %s3280_s12, 4  ;;  %s3099_s10 = scalar_lea.vmem %s385_s9, 2048  ;;  %s413_s7 = int_to_ptr.vmem [resolvable:$true] %s412_s7 }
  0x6f   : > { %p3100_p10 = scmp.ne.s32.totalorder %s385_s9, %s3099_s10  ;;  %p3947_p13 = scmp.ne.s32.totalorder %s3939_s23, 0 }
  0x70   : > { %p3107_p6 = scmp.lt.s32.totalorder %s385_s9, %s385_s9  ;;  %p3108_p7 = scmp.lt.s32.totalorder %s3099_s10, %s3099_s10 }
  0x71   : > { %p3948_p0 = pneg %p3947_p13 }
  0x72   : > { %p3109_p11 = por %p3108_p7, %p3107_p6 }
  0x73   : > { %p3102_p4 = pnand %p3100_p10, %p3948_p0 }
  0x75   : > { %p3103_p12 = pneg %p3102_p4 }
  0x77   : > { %p3110_p1 = pnand %p3109_p11, %p3103_p12 }
  0x79   : > { %3113 = shalt.err (!%p3110_p1)
}
  0x7a   : > { %2786 = dma.hbm_to_vmem [thread:$0]  (!%p3947_p13), %s3899_s2, 2048, %s385_s9, [#allocation5], %s3277_s13, %s3277_s13, %s3278_s14  }
  0x7b   : > { %s2426_s12 = sshll.u32 %s3428_s24, 6  ;;  %s3125_s20 = scalar_lea.vmem %s413_s7, 32 }
  0x7c   : > { %p3126_p3 = scmp.ne.s32.totalorder %s413_s7, %s3125_s20  ;;  %p3949_p5 = pmov %p3948_p0 }
  0x7d   : > { %p3133_p0 = scmp.lt.s32.totalorder %s413_s7, %s413_s7  ;;  %p3134_p4 = scmp.lt.s32.totalorder %s3125_s20, %s3125_s20 }
  0x7e   : > { %p3128_p8 = pnand %p3126_p3, %p3949_p5 }
  0x7f   : > { %p3135_p12 = por %p3134_p4, %p3133_p0 }
  0x80   : > { %p3129_p10 = pneg %p3128_p8 }
  0x82   : > { %p3136_p6 = pnand %p3135_p12, %p3129_p10 }
  0x84   : > { %3139 = shalt.err (!%p3136_p6)
}
  0x85   : > { %2792 = dma.hbm_to_vmem [thread:$0]  (!%p3947_p13), %s3902_s5, 32, %s413_s7, [#allocation8]  }
  0x86   : > { %s2547_s9 = sshll.u32 %s3270_s28, 10  ;;  %s455_s15 = scalar_lea.vmem [#allocation12], %s2426_s12 }
  0x87   : > { %s3558_s14 = scalar_lea.hbm %s3905_s8, %s2547_s9  ;;  %s462_s21 = sshll.u32 %s455_s15, 4  ;;  %s3560_s21 = int_to_ptr.vmem [resolvable:$true] %s462_s21 }
  0x88   : > { %s3140_s23 = scalar_lea.hbm %s3558_s14, 1024  ;;  %s3145_s28 = scalar_lea.hbm %s3905_s8, 2048 }
  0x89   : > { %p3141_p7 = scmp.ne.s32.totalorder %s3558_s14, %s3140_s23  ;;  %p3146_p13 = scmp.lt.s32.totalorder %s3558_s14, %s3905_s8 }
  0x8a   : > { %p3147_p3 = scmp.lt.s32.totalorder %s3145_s28, %s3140_s23 }
  0x8b   : > { %p3143_p11 = pnand %p3141_p7, %p3465_p2 }
  0x8c   : > { %p3148_p5 = por %p3147_p3, %p3146_p13 }
  0x8d   : > { %p3144_p1 = pneg %p3143_p11 }
  0x8f   : > { %p3149_p8 = pnand %p3148_p5, %p3144_p1 }
  0x91   : > { %3152 = shalt.err (!%p3149_p8)
}
  0x92   : > { %s3153_s4 = scalar_lea.vmem %s3560_s21, 1024  ;;  %s3281_s12 = smov [#allocation12]  }
  0x93   : > { %p3154_p10 = scmp.ne.s32.totalorder %s3560_s21, %s3153_s4  ;;  %s3158_s20 = sshll.u32 %s3281_s12, 4  ;;  %s3159_s20 = int_to_ptr.vmem [resolvable:$false] %s3158_s20 }
  0x94   : > { %s3160_s10 = scalar_lea.vmem %s3159_s20, 2048  ;;  %p3161_p12 = scmp.lt.s32.totalorder %s3560_s21, %s3159_s20 }
  0x95   : > { %p3156_p0 = pnand %p3154_p10, %p3465_p2  ;;  %p3162_p6 = scmp.lt.s32.totalorder %s3160_s10, %s3153_s4 }
  0x97   : > { %p3157_p4 = pneg %p3156_p0  ;;  %p3163_p7 = por %p3162_p6, %p3161_p12 }
  0x99   : > { %p3164_p11 = pnand %p3163_p7, %p3157_p4 }
  0x9b   : > { %3167 = shalt.err (!%p3164_p11)
}
  0x9c   : > { %s3282_s17 = smov 64   ;;  %s3283_s9 = smov 4  }
  0x9d   : > { %2799 = dma.hbm_to_vmem [thread:$0]  (!%p3451_p9), %s3558_s14, 1024, %s3560_s21, %s3459_s22, %s3282_s17, %s3282_s17, %s3283_s9  }
  0x9e   : > { %s3168_s24 = scalar_lea.hbm %s3531_s25, 2048  ;;  %s3173_s23 = scalar_lea.hbm %s3908_s11, 4096 }
  0x9f   : > { %p3169_p1 = scmp.ne.s32.totalorder %s3531_s25, %s3168_s24  ;;  %p3174_p5 = scmp.lt.s32.totalorder %s3531_s25, %s3908_s11 }
  0xa0   : > { %p3175_p8 = scmp.lt.s32.totalorder %s3173_s23, %s3168_s24 }
  0xa1   : > { %p3171_p13 = pnand %p3169_p1, %p3465_p2 }
  0xa2   : > { %p3176_p10 = por %p3175_p8, %p3174_p5 }
  0xa3   : > { %p3172_p3 = pneg %p3171_p13 }
  0xa5   : > { %p3177_p0 = pnand %p3176_p10, %p3172_p3 }
  0xa7   : > { %3180 = shalt.err (!%p3177_p0)
}
  0xa8   : > { %s3181_s22 = scalar_lea.vmem %s3535_s30, 2048  ;;  %s3284_s14 = smov [#allocation15]  }
  0xa9   : > { %p3182_p4 = scmp.ne.s32.totalorder %s3535_s30, %s3181_s22  ;;  %s3186_s21 = sshll.u32 %s3284_s14, 4  ;;  %s3187_s21 = int_to_ptr.vmem [resolvable:$false] %s3186_s21 }
  0xaa   : > { %s3188_s28 = scalar_lea.vmem %s3187_s21, 4096  ;;  %p3189_p7 = scmp.lt.s32.totalorder %s3535_s30, %s3187_s21 }
  0xab   : > { %p3184_p12 = pnand %p3182_p4, %p3465_p2  ;;  %p3190_p11 = scmp.lt.s32.totalorder %s3188_s28, %s3181_s22 }
  0xad   : > { %p3185_p6 = pneg %p3184_p12  ;;  %p3191_p1 = por %p3190_p11, %p3189_p7 }
  0xaf   : > { %p3192_p13 = pnand %p3191_p1, %p3185_p6 }
  0xb1   : > { %3195 = shalt.err (!%p3192_p13)
}
  0xb2   : > { %2805 = dma.hbm_to_vmem [thread:$0]  (!%p3451_p9), %s3531_s25, 2048, %s3535_s30, %s3503_s0, %s3282_s17, %s3282_s17, %s3283_s9  }
  0xb3   : > { %p3950_p2 = scmp.ne.s32.totalorder %s3938_s19, 0 }
  0xb4   : > { %p3951_p3 = scmp.eq.s32.totalorder (!%p3950_p2), %s3384_s29, 0 }
  0xb5   : > { %530 = sbr.rel (%p3950_p2) target bundleno = 3754 (0xeaa), region = 72 }
  0xba   : > { %3237 = dma.done.wait (%p3951_p3), [#allocation5], 2048   ;;  %p3952_p5 = pmov %p3951_p3 }
  0xbb   : > { %p3953_p8 = pmov %p3951_p3 }
  0xbc   : > { %3239 = vsyncadd (%p3952_p5), [#allocation5], 4294965248 }
  0xbd   : > { %3241 = dma.done.wait (%p3953_p8), [#allocation8], 64   ;;  %p3954_p10 = pmov %p3951_p3 }
  0xbe   : > { %s544_s3 = sand.u32 1, %s3384_s29   ;;  %s546_s0 = sand.u32 1, %s3262_s26  }
  0xbf   : > { %3243 = vsyncadd (%p3954_p10), [#allocation8], 4294967232  ;;  %s2757_s16 = smul.u32 192, %s546_s0  ;;  %s545_s19 = scalar_lea.sflag [#allocation11], %s544_s3 }
  0xc0   : > { %p3955_p9 = scmp.ne.s32.totalorder %s3937_s18, 0 }
  0xc1   : > { %s3622_s25 = scalar_lea.vmem [#allocation10], %s2757_s16 }
  0xc2   : > { %3245 = dma.done.wait (%p3955_p9), %s545_s19, 4096  }
  0xc3   : > { %3247 = vsyncadd (%p3955_p9), %s545_s19, 4294963200  ;;  %s2439_s30 = sshll.u32 %s546_s0, 6  ;;  %s2440_s27 = sshll.u32 %s546_s0, 7 }
  0xc4   : > { %s3628_s6 = scalar_lea.vmem [#allocation12], %s2439_s30  ;;  %s563_s4 = scalar_lea.sflag [#allocation14], %s544_s3 }
  0xc5   : > { %s3630_s12 = scalar_lea.vmem [#allocation13], %s2440_s27 }
  0xc6   : > { %3249 = dma.done.wait (%p3955_p9), %s563_s4, 4096  }
  0xc7   : > { %3251 = vsyncadd (%p3955_p9), %s563_s4, 4294963200  ;;  %p640_p0 = scmp.lt.s32.totalorder %s3384_s29, 1  ;;  %s3956_s13 = sld [smem:[#allocation32_spill]] }
  0xc8   : > { %s3957_s22 = sld [smem:[#allocation30_spill]]  ;;  %s3653_s0 = scalar_lea.vmem [#allocation15], %s2440_s27 }
  0xc9   : > { %s641_s20 = scalar_select %p640_p0, %s3384_s29, 1 }
  0xca   : > { %s3958_s28 = sld [smem:[#allocation33_spill]]  ;;  %p3959_p4 = scmp.ne.s32.totalorder %s3384_s29, 0 }
  0xcb   : > { %s2758_s10 = smul.u32 3, %s641_s20  ;;  %s2442_s17 = sshll.u32 %s641_s20, 1 }
  0xcc   : > { %s2443_s23 = sshll.u32 %s641_s20, 3  ;;  %656 = sbr.rel (%p3959_p4) target bundleno = 847 (0x34f), region = 104 }
  0xcd   : > { %s3641_s15 = scalar_lea.vmem %s3956_s13, %s2442_s17  ;;  %s3960_s30 = sld [smem:[#allocation25_spill]] (!%p3959_p4) }
  0xce   : > { %s3646_s14 = scalar_lea.vmem %s3957_s22, %s2758_s10  ;;  %s3961_s17 = sld [smem:[#allocation26_spill]] (!%p3959_p4) }
  0xcf   : > { %s3962_s1 = sld [smem:[#allocation27_spill]] (!%p3959_p4) }
  0xd0   : > { %s3651_s3 = scalar_lea.vmem %s3958_s28, %s2443_s23 }
  0xd1   : > { %v3285_v2 = vmov 0   ;;  %v688_v4 = vld [vmem:[#allocation4 + $0x78] sm:$0xff]  ;;  %v687_v5 = vld [vmem:[#allocation4 + $0x70] sm:$0xff]  ;;  %v3286_v6 = vmov 0.0   ;;  %v686_v11 = vld [vmem:[#allocation4 + $0x68] sm:$0xff]  ;;  %v659_v27 = vlaneseq  ;;  %v3287_v30 = vmov 1.0  }
  0xd2   : > { %2866 = vset.pattern.permute.xlu0 %v3285_v2  ;;  %2867 = vset.pattern.permute.xlu1 %v3285_v2  ;;  %v685_v13 = vld [vmem:[#allocation4 + $0x60] sm:$0xff]  ;;  %v684_v15 = vld [vmem:[#allocation4 + $0x58] sm:$0xff]  ;;  %v683_v16 = vld [vmem:[#allocation4 + $0x50] sm:$0xff] }
  0xd3   : > { %v657_v0 = vld [vmem:[%s3960_s30] sm:$0xff]  ;;  %2632 = vmatprep.subr.mxu0 %v688_v4  ;;  %v658_v8 = vld [vmem:[%s3960_s30 + $0x8] sm:$0xff]  ;;  %v681_v18 = vld [vmem:[#allocation4 + $0x40] sm:$0xff]  ;;  %v660_v28 = vand.u32 127, %v659_v27 }
  0xd4   : > { %v689_v1 = vld [vmem:[%s3961_s17] sm:$0xff]  ;;  %v690_v3 = vld [vmem:[%s3961_s17 + $0x8] sm:$0xff]  ;;  %662 = vperm.xlu0 %2866, %v657_v0   ;;  %2633 = vmatpush3.msra.mxu0 %v688_v4  ;;  %v680_v19 = vld [vmem:[#allocation4 + $0x38] sm:$0xff] }
  0xd5   : > { %vm691_vm0 = vcmp.ne.s32.totalorder %v689_v1, 0  ;;  %vm692_vm1 = vcmp.ne.s32.totalorder %v690_v3, 0  ;;  %2634 = vmatprep.subr.mxu0 %v687_v5  ;;  %v682_v17 = vld [vmem:[#allocation4 + $0x48] sm:$0xff]  ;;  %v679_v20 = vld [vmem:[#allocation4 + $0x30] sm:$0xff]  ;;  %v677_v22 = vld [vmem:[#allocation4 + $0x20] sm:$0xff] }
  0xd6   : > { %v2447_v7 = vsel %vm691_vm0, 1.0, %v3286_v6  ;;  %v2448_v9 = vsel %vm692_vm1, 1.0, %v3286_v6  ;;  %2635 = vmatpush3.msra.mxu0 %v687_v5  ;;  %v678_v21 = vld [vmem:[#allocation4 + $0x28] sm:$0xff]  ;;  %v676_v23 = vld [vmem:[#allocation4 + $0x18] sm:$0xff]  ;;  %v675_v24 = vld [vmem:[#allocation4 + $0x10] sm:$0xff] }
  0xd7   : > { %v697_v10 = vsub.f32 1.0, %v2447_v7  ;;  %v698_v12 = vsub.f32 1.0, %v2448_v9  ;;  %v2868_v14 = vpack.i.bf16 %v2448_v9, %v2447_v7  ;;  %2636 = vmatprep.subr.mxu0 %v686_v11  ;;  %v674_v25 = vld [vmem:[#allocation4 + $0x8] sm:$0xff]  ;;  %v673_v26 = vld [vmem:[#allocation4] sm:$0xff]  ;;  %v736_v41 = vld [vmem:[%s3962_s1 + $0x8] sm:$0xff] }
  0xd8   : > { %665 = vperm.xlu0 %2866, %v658_v8   ;;  %2637 = vmatpush3.msra.mxu0 %v686_v11  ;;  %v2449_v35 = vld [vmem:[#allocation7] ss:$0 sm:$0xff]  ;;  %v2450_v36 = vld [vmem:[#allocation7 + $0x1] ss:$0 sm:$0xff]  ;;  %v735_v45 = vld [vmem:[%s3962_s1] sm:$0xff] }
  0xd9   : > { %702 = vperm.xlu1 %2867, %v697_v10   ;;  %2638 = vmatprep.subr.mxu0 %v685_v13  ;;  %v2453_v4 = vld [vmem:[#allocation9] ss:$0 sm:$0xff]  ;;  %v2454_v7 = vld [vmem:[#allocation9 + $0x1] ss:$0 sm:$0xff] }
  0xda   : > { %2639 = vmatpush3.msra.mxu0 %v685_v13 }
  0xdb   : > { %2640 = vmatprep.subr.mxu0 %v684_v15 }
  0xdc   : > { %2869 = vperm.xlu0 %2866, %v2868_v14   ;;  %2641 = vmatpush3.msra.mxu0 %v684_v15 }
  0xdd   : > { %707 = vperm.xlu1 %2867, %v698_v12   ;;  %2642 = vmatprep.subr.mxu0 %v683_v16 }
  0xde   : > { %2643 = vmatpush3.msra.mxu0 %v683_v16 }
  0xdf   : > { %2644 = vmatprep.subr.mxu0 %v682_v17 }
  0xe0   : > { %2645 = vmatpush3.msra.mxu0 %v682_v17 }
  0xe1   : > { %2646 = vmatprep.subr.mxu0 %v681_v18 }
  0xe2   : > { %2647 = vmatpush3.msra.mxu0 %v681_v18 }
  0xe3   : > { %2648 = vmatprep.subr.mxu0 %v680_v19 }
  0xe4   : > { %2649 = vmatpush3.msra.mxu0 %v680_v19 }
  0xe5   : > { %2650 = vmatprep.subr.mxu0 %v679_v20 }
  0xe6   : > { %2651 = vmatpush3.msra.mxu0 %v679_v20 }
  0xe7   : > { %2652 = vmatprep.subr.mxu0 %v678_v21 }
  0xe8   : > { %2653 = vmatpush3.msra.mxu0 %v678_v21 }
  0xe9   : > { %2654 = vmatprep.subr.mxu0 %v677_v22 }
  0xea   : > { %2655 = vmatpush3.msra.mxu0 %v677_v22 }
  0xeb   : > { %2656 = vmatprep.subr.mxu0 %v676_v23 }
  0xec   : > { %2657 = vmatpush3.msra.mxu0 %v676_v23 }
  0xed   : > { %2658 = vmatprep.subr.mxu0 %v675_v24 }
  0xee   : > { %2659 = vmatpush3.msra.mxu0 %v675_v24 }
  0xef   : > { %2660 = vmatprep.subr.mxu0 %v674_v25 }
  0xf0   : > { %2661 = vmatpush3.msra.mxu0 %v674_v25 }
  0xf1   : > { %2662 = vmatprep.subr.mxu0 %v673_v26 }
  0xf2   : > { %2663 = vmatpush3.msra.mxu0 %v673_v26 }
 0x14f   : > { %v663_v29 = vpop.permute.xlu0 %662 }
 0x150   : > { %vm667_vm2 = vcmp.eq.s32.totalorder %v660_v28, %v663_v29 }
 0x151   : > { %2664 = vmatprep.mubr.msk.f32.mxu0 %vm667_vm2, %v3287_v30 }
 0x153   : > { %v666_v31 = vpop.permute.xlu0 %665 }
 0x154   : > { %vm668_vm3 = vcmp.eq.s32.totalorder %v660_v28, %v666_v31  ;;  %v703_v32 = vpop.permute.xlu1 %702 }
 0x155   : > { %2665 = vmatmul.mubr.msk.f32.vlgmr.msra.gmra.mxu0 %vm668_vm3, %v3287_v30  ;;  %v714_v42 = vmul.f32 %v2449_v35, %v703_v32 }
 0x157   : > { %v2870_v33 = vpop.permute.xlu0 %2869 }
 0x158   : > { %v2872_v34 = vunpack.i.h.bf16 %v2870_v33  ;;  %v708_v37 = vpop.permute.xlu1 %707  ;;  %v2871_v38 = vunpack.i.l.bf16 %v2870_v33 }
 0x159   : > { %v715_v40 = vmul.f32 %v2449_v35, %v708_v37 }
 0x15a   : > { %v732_v39 = vmul.f32 %v2872_v34, %v2450_v36  ;;  %v731_v43 = vmul.f32 %v2871_v38, %v2450_v36 }
 0x15c   : > { %v734_v46 = vadd.f32 %v732_v39, %v715_v40  ;;  %v733_v51 = vadd.f32 %v731_v43, %v714_v42 }
 0x215   : > { %v2666_v44 = vpop.f32.mrf.mxu0 }
 0x216   : > { %v809_v47 = vadd.f32 %v2666_v44, %v736_v41 }
 0x217   : > { %v803_v48 = vpop.f32.mrf.mxu0 }
 0x218   : > { %v804_v49 = vadd.f32 %v803_v48, %v735_v45  ;;  %v813_v50 = vadd.f32 %v809_v47, %v734_v46 }
 0x21a   : > { %818 = vadd.xlane.f32.xlu0 %v813_v50  ;;  %v812_v52 = vadd.f32 %v804_v49, %v733_v51 }
 0x21c   : > { %816 = vadd.xlane.f32.xlu1 %v812_v52 }
 0x2a3   : > { %v819_v53 = vpop.xlane.xlu0 %818 }
 0x2a4   : > { %v822_v54 = vmul.f32 0.0078125, %v819_v53 }
 0x2a5   : > { %v817_v55 = vpop.xlane.xlu1 %816 }
 0x2a6   : > { %v824_v56 = vsub.f32 %v813_v50, %v822_v54  ;;  %v821_v57 = vmul.f32 0.0078125, %v817_v55 }
 0x2a8   : > { %v823_v58 = vsub.f32 %v812_v52, %v821_v57  ;;  %v826_v59 = vmul.f32 %v824_v56, %v824_v56 }
 0x2aa   : > { %829 = vadd.xlane.f32.xlu1 %v826_v59  ;;  %v825_v60 = vmul.f32 %v823_v58, %v823_v58 }
 0x2ac   : > { %827 = vadd.xlane.f32.xlu0 %v825_v60 }
 0x333   : > { %v830_v61 = vpop.xlane.xlu1 %829 }
 0x334   : > { %v832_v62 = vmul.f32 0.0078125, %v830_v61 }
 0x335   : > { %v828_v63 = vpop.xlane.xlu0 %827 }
 0x336   : > { %v834_v0 = vadd.f32 1e-12, %v832_v62  ;;  %v831_v1 = vmul.f32 0.0078125, %v828_v63 }
 0x338   : > { %2873 = vrsqrt.f32 %v834_v0  ;;  %v833_v2 = vadd.f32 1e-12, %v831_v1 }
 0x33a   : > { %2875 = vrsqrt.f32 %v833_v2 }
 0x345   : > { %v2874_v3 = vpop.eup %2873 }
 0x346   : > { %v838_v5 = vmul.f32 %v2874_v3, %v824_v56 }
 0x347   : > { %v2876_v6 = vpop.eup %2875 }
 0x348   : > { %v844_v8 = vmul.f32 %v2453_v4, %v838_v5  ;;  %v837_v9 = vmul.f32 %v2876_v6, %v823_v58 }
 0x34a   : > { %v850_v10 = vadd.f32 %v2454_v7, %v844_v8  ;;  %v843_v11 = vmul.f32 %v2453_v4, %v837_v9 }
 0x34c   : > { %852 = vst [vmem:[#allocation2 + $0x8] sm:$0xff] %v850_v10  ;;  %v849_v12 = vadd.f32 %v2454_v7, %v843_v11 }
 0x34e   : > { %851 = vst [vmem:[#allocation2] sm:$0xff] %v849_v12 }
 0x34f PF: > { %v2877_v13 = vld [vmem:[%s3622_s25 + $0xac] ss:$12 sps:$4 sm:$0xff]   ;;  %v2879_v14 = vld [vmem:[%s3622_s25 + $0xa8] ss:$12 sps:$4 sm:$0xff]   ;;  %v3288_v15 = vmov 0   ;;  %v3289_v16 = vmov 0.0   ;;  %v890_v42 = vlaneseq }
 0x350   : > { %1065 = vmatprep.mubr.bf16.mxu0 %v3288_v15  ;;  %2667 = vmatprep.subr.bf16.mxu1 %v3289_v16  ;;  %v2880_v17 = vld [vmem:[%s3622_s25 + $0x94] ss:$12 sps:$4 sm:$0xff]   ;;  %v2882_v18 = vld [vmem:[%s3622_s25 + $0x90] ss:$12 sps:$4 sm:$0xff]   ;;  %v2885_v20 = vld [vmem:[%s3622_s25 + $0x78] ss:$12 sps:$4 sm:$0xff]  }
 0x351   : > { %1033 = vmatprep.subr.bf16.mxu0 %v2877_v13  ;;  %v2883_v19 = vld [vmem:[%s3622_s25 + $0x7c] ss:$12 sps:$4 sm:$0xff]   ;;  %v2886_v21 = vld [vmem:[%s3622_s25 + $0x64] ss:$12 sps:$4 sm:$0xff]   ;;  %v2888_v22 = vld [vmem:[%s3622_s25 + $0x60] ss:$12 sps:$4 sm:$0xff]  }
 0x352   : > { %1034 = vmatpush1.bf16.msra.mxu0 %v2879_v14  ;;  %v2889_v23 = vld [vmem:[%s3622_s25 + $0x4c] ss:$12 sps:$4 sm:$0xff]   ;;  %v2901_v24 = vld [vmem:[%s3622_s25 + $0xb0] ss:$12 sps:$4 sm:$0xff]   ;;  %v2891_v26 = vld [vmem:[%s3622_s25 + $0x48] ss:$12 sps:$4 sm:$0xff]  }
 0x353   : > { %1035 = vmatprep.subr.bf16.mxu0 %v2880_v17  ;;  %2668 = vmatpush3.bf16.msra.mxu1 %v2901_v24  ;;  %v2902_v25 = vld [vmem:[%s3622_s25 + $0x98] ss:$12 sps:$4 sm:$0xff]   ;;  %v2892_v27 = vld [vmem:[%s3622_s25 + $0x34] ss:$12 sps:$4 sm:$0xff]   ;;  %v2894_v28 = vld [vmem:[%s3622_s25 + $0x30] ss:$12 sps:$4 sm:$0xff]  }
 0x354   : > { %2669 = vmatprep.subr.bf16.mxu1 %v3289_v16  ;;  %v2895_v29 = vld [vmem:[%s3622_s25 + $0x1c] ss:$12 sps:$4 sm:$0xff]   ;;  %v2903_v30 = vld [vmem:[%s3622_s25 + $0x80] ss:$12 sps:$4 sm:$0xff]   ;;  %v2897_v32 = vld [vmem:[%s3622_s25 + $0x18] ss:$12 sps:$4 sm:$0xff]  }
 0x355   : > { %v2904_v31 = vld [vmem:[%s3622_s25 + $0x68] ss:$12 sps:$4 sm:$0xff]   ;;  %v2898_v33 = vld [vmem:[%s3622_s25 + $0x4] ss:$12 sps:$4 sm:$0xff]   ;;  %v2900_v35 = vld [vmem:[%s3622_s25] ss:$12 sps:$4 sm:$0xff]  }
 0x356   : > { %1036 = vmatpush1.bf16.msra.mxu0 %v2882_v18  ;;  %v2905_v34 = vld [vmem:[%s3622_s25 + $0x50] ss:$12 sps:$4 sm:$0xff]   ;;  %v3701_v36 = vld [vmem:[#allocation2] sm:$0xff]  ;;  %v2907_v40 = vld [vmem:[%s3622_s25 + $0x20] ss:$12 sps:$4 sm:$0xff]   ;;  %vm3290_vm4 = vmmov 0  }
 0x357   : > { %1037 = vmatprep.subr.bf16.mxu0 %v2883_v19  ;;  %2670 = vmatpush3.bf16.msra.mxu1 %v2902_v25  ;;  %v3703_v37 = vld [vmem:[#allocation2 + $0x8] sm:$0xff]  ;;  %v2906_v38 = vld [vmem:[%s3622_s25 + $0x38] ss:$12 sps:$4 sm:$0xff]   ;;  %v2908_v41 = vld [vmem:[%s3622_s25 + $0x8] ss:$12 sps:$4 sm:$0xff]   ;;  %v3722_v43 = vshrl.u32 %v890_v42, 7 }
 0x358   : > { %2671 = vmatprep.subr.bf16.mxu1 %v3289_v16  ;;  %v855_v39 = vpack.c.bf16 %v3703_v37, %v3701_v36  ;;  %2683 = vmatprep.mubr.msk.bf16.mxu1 %vm3290_vm4, %v3289_v16  ;;  %v888_v46 = vld [vmem:[%s3646_s14] sm:$0x7]  ;;  %vm1120_vm5 = vcmask 261120   ;;  %vm1170_vm6 = vcmask 130048   ;;  %s3291_s25 = smov 96   ;;  %s3292_s14 = smov 32  }
 0x359   : > { %v896_v44 = vsub.s32 1, %v3722_v43  ;;  %v892_v51 = vsub.s32 0, %v3722_v43  ;;  %v900_v60 = vsub.s32 2, %v3722_v43  ;;  %s3293_s21 = smov 64   ;;  %vm1246_vm7 = vcmask 257024   ;;  %p2542_p12 = scmp.ne.s32.totalorder %s3384_s29, 1 }
 0x35a   : > { %1038 = vmatpush1.bf16.msra.mxu0 %v2885_v20  ;;  %vm1387_vm8 = vcmask 519424   ;;  %vm1525_vm9 = vcmask 781824   ;;  %vm1663_vm10 = vcmask 1044224  }
 0x35b   : > { %1039 = vmatprep.subr.bf16.mxu0 %v2886_v21  ;;  %2672 = vmatpush3.bf16.msra.mxu1 %v2903_v30  ;;  %v897_v48 = vrot.slane %v888_v46, %v896_v44  ;;  %v893_v55 = vrot.slane %v888_v46, %v892_v51  ;;  %v901_v61 = vrot.slane %v888_v46, %v900_v60 }
 0x35c   : > { %2673 = vmatprep.subr.bf16.mxu1 %v3289_v16 }
 0x35e   : > { %1040 = vmatpush1.bf16.msra.mxu0 %v2888_v22 }
 0x35f   : > { %1041 = vmatprep.subr.bf16.mxu0 %v2889_v23  ;;  %2674 = vmatpush3.bf16.msra.mxu1 %v2904_v31 }
 0x360   : > { %2675 = vmatprep.subr.bf16.mxu1 %v3289_v16 }
 0x362   : > { %1042 = vmatpush1.bf16.msra.mxu0 %v2891_v26 }
 0x363   : > { %1043 = vmatprep.subr.bf16.mxu0 %v2892_v27  ;;  %2676 = vmatpush3.bf16.msra.mxu1 %v2905_v34 }
 0x364   : > { %2677 = vmatprep.subr.bf16.mxu1 %v3289_v16 }
 0x366   : > { %1044 = vmatpush1.bf16.msra.mxu0 %v2894_v28 }
 0x367   : > { %1045 = vmatprep.subr.bf16.mxu0 %v2895_v29  ;;  %2678 = vmatpush3.bf16.msra.mxu1 %v2906_v38 }
 0x368   : > { %2679 = vmatprep.subr.bf16.mxu1 %v3289_v16 }
 0x36a   : > { %1046 = vmatpush1.bf16.msra.mxu0 %v2897_v32 }
 0x36b   : > { %1047 = vmatprep.subr.bf16.mxu0 %v2898_v33  ;;  %2680 = vmatpush3.bf16.msra.mxu1 %v2907_v40 }
 0x36c   : > { %2681 = vmatprep.subr.bf16.mxu1 %v3289_v16 }
 0x36e   : > { %1048 = vmatpush1.bf16.msra.mxu0 %v2900_v35 }
 0x36f   : > { %2711 = vmatprep.subr.bf16.mxu0 %v3289_v16  ;;  %2682 = vmatpush3.bf16.msra.mxu1 %v2908_v41 }
 0x370   : > { %2687 = vmatprep.subr.bf16.mxu1 %v3289_v16 }
 0x371   : > { %1066 = vmatmul.mubr.bf16.vlgmr.msra.gmra.mxu0 %v855_v39 }
 0x372   : > { %2713 = vmatprep.mubr.msk.bf16.mxu0 %vm3290_vm4, %v3289_v16  ;;  %2684 = vmatmul.mubr.bf16.vlgmr.msra.gmra.mxu1 %v855_v39 }
 0x373   : > { %2689 = vmatprep.mubr.msk.bf16.mxu1 %vm3290_vm4, %v3289_v16 }
 0x431   : > { %v1067_v45 = vpop.f32.mrf.mxu0 }
 0x432   : > { %v1068_v58 = vadd.f32 %v1067_v45, %v893_v55  ;;  %v1110_v62 = vpop.f32.mrf.mxu1 }
 0x433   : > { %v1069_v47 = vpop.f32.mrf.mxu0  ;;  %v1111_v0 = vadd.f32 %v1110_v62, %v901_v61 }
 0x434   : > { %v1070_v52 = vadd.f32 %v1069_v47, %v897_v48  ;;  %v2685_v63 = vpop.f32.mrf.mxu1 }
 0x435   : > { %v1071_v49 = vpop.f32.mrf.mxu0 }
 0x436   : > { %v1072_v57 = vadd.f32 %v1071_v49, %v893_v55  ;;  %v1113_v1 = vpop.f32.mrf.mxu1 }
 0x437   : > { %v1073_v50 = vpop.f32.mrf.mxu0  ;;  %v1114_v2 = vadd.f32 %v1113_v1, %v901_v61 }
 0x438   : > { %v1074_v53 = vadd.f32 %v1073_v50, %v897_v48  ;;  %v1117_v59 = vpack.c.bf16 %v1072_v57, %v1068_v58  ;;  %v2686_v3 = vpop.f32.mrf.mxu1 }
 0x439   : > { %v3737_v4 = vpack.c.bf16 %v1114_v2, %v1111_v0 }
 0x43a   : > { %v1118_v54 = vpack.c.bf16 %v1074_v53, %v1070_v52 }
 0x43c   : > { %v1125_v56 = vsel %vm1120_vm5, %v1118_v54, 0 }
 0x43d   : > { %2688 = vmatpush3.bf16.xpose.msra.mxu1 %v1125_v56 }
 0x43e   : > { %2693 = vmatprep.subr.bf16.mxu1 %v3289_v16 }
 0x444   : > { %2690 = vmatmul.mubr.msk.bf16.vlgmr.msra.gmra.mxu1 %vm1120_vm5, %v1117_v59 }
 0x445   : > { %2695 = vmatprep.mubr.msk.bf16.mxu1 %vm3290_vm4, %v3289_v16  ;;  %2694 = vmatpush3.bf16.msra.mxu1 %v3737_v4 }
 0x446   : > { %2699 = vmatprep.subr.bf16.mxu1 %v3289_v16 }
 0x504   : > { %v1161_v5 = vpop.f32.mrf.mxu1 }
 0x505   : > { %v1168_v6 = vmul.f32 0.17677669, %v1161_v5 }
 0x506   : > { %v2691_v7 = vpop.f32.mrf.mxu1 }
 0x507   : > { %v1171_v8 = vsel %vm1170_vm6, %v1168_v6, -inf }
 0x508   : > { %1172 = vmax.xlane.f32.xlu0 %v1171_v8  ;;  %v1164_v9 = vpop.f32.mrf.mxu1 }
 0x509   : > { %v1169_v10 = vmul.f32 0.17677669, %v1164_v9 }
 0x50a   : > { %v2692_v11 = vpop.f32.mrf.mxu1 }
 0x50b   : > { %v1174_v12 = vsel %vm1170_vm6, %v1169_v10, -inf }
 0x50c   : > { %1175 = vmax.xlane.f32.xlu0 %v1174_v12 }
 0x522   : > { %1253 = vrot.lane.b32.xlu0 %v1118_v54, %s3291_s25 }
 0x526   : > { %1530 = vrot.lane.b32.xlu0 %v1118_v54, %s3292_s14 }
 0x591   : > { %v1173_v13 = vpop.xlane.xlu0 %1172 }
 0x592   : > { %v1177_v14 = vsub.f32 %v1168_v6, %v1173_v13 }
 0x594   : > { %v1179_v17 = vmul.f32 1.442695, %v1177_v14 }
 0x595   : > { %v1176_v18 = vpop.xlane.xlu0 %1175 }
 0x596   : > { %2958 = vpow2.f32 %v1179_v17  ;;  %v1178_v19 = vsub.f32 %v1169_v10, %v1176_v18 }
 0x598   : > { %v1181_v20 = vmul.f32 1.442695, %v1178_v19 }
 0x599   : > { %v1254_v28 = vpop.permute.xlu0 %1253 }
 0x59a   : > { %2960 = vpow2.f32 %v1181_v20  ;;  %v1259_v41 = vsel %vm1120_vm5, %v1254_v28, 0 }
 0x59d   : > { %v1531_v33 = vpop.permute.xlu0 %1530 }
 0x59e   : > { %v1536_v39 = vsel %vm1120_vm5, %v1531_v33, 0 }
 0x5a3   : > { %v2959_v21 = vpop.eup %2958 }
 0x5a4   : > { %v1183_v22 = vsel %vm1170_vm6, %v2959_v21, 0.0 }
 0x5a5   : > { %1184 = vadd.xlane.f32.xlu1 %v1183_v22 }
 0x5a7   : > { %v2961_v23 = vpop.eup %2960 }
 0x5a8   : > { %v1186_v24 = vsel %vm1170_vm6, %v2961_v23, 0.0 }
 0x5a9   : > { %1187 = vadd.xlane.f32.xlu1 %v1186_v24 }
 0x5ba   : > { %1250 = vrot.lane.b32.xlu1 %v1117_v59, %s3291_s25 }
 0x5be   : > { %1392 = vrot.lane.b32.xlu1 %v1118_v54, %s3293_s21 }
 0x5c2   : > { %1390 = vrot.lane.b32.xlu1 %v1117_v59, %s3293_s21 }
 0x5c6   : > { %1528 = vrot.lane.b32.xlu1 %v1117_v59, %s3292_s14 }
 0x62e   : > { %v1185_v25 = vpop.xlane.xlu1 %1184 }
 0x62f   : > { %2962 = vrcp.f32 %v1185_v25 }
 0x632   : > { %v1188_v26 = vpop.xlane.xlu1 %1187 }
 0x633   : > { %2964 = vrcp.f32 %v1188_v26 }
 0x636   : > { %v1251_v27 = vpop.permute.xlu1 %1250 }
 0x63a   : > { %v1393_v29 = vpop.permute.xlu1 %1392 }
 0x63b   : > { %v1398_v30 = vsel %vm1120_vm5, %v1393_v29, 0 }
 0x63c   : > { %2712 = vmatpush3.bf16.xpose.msra.mxu0 %v1398_v30  ;;  %v2963_v31 = vpop.eup %2962 }
 0x63d   : > { %2723 = vmatprep.subr.bf16.mxu0 %v3289_v16  ;;  %v1191_v34 = vmul.f32 %v2963_v31, %v2959_v21 }
 0x63e   : > { %v1391_v38 = vpop.permute.xlu1 %1390 }
 0x640   : > { %v2965_v32 = vpop.eup %2964 }
 0x641   : > { %v1192_v35 = vmul.f32 %v2965_v32, %v2961_v23 }
 0x642   : > { %v1529_v42 = vpop.permute.xlu1 %1528 }
 0x643   : > { %2714 = vmatmul.mubr.msk.bf16.vlgmr.msra.gmra.mxu0 %vm1120_vm5, %v1391_v38  ;;  %v1193_v40 = vpack.c.bf16 %v1192_v35, %v1191_v34 }
 0x644   : > { %2724 = vmatpush3.bf16.xpose.msra.mxu0 %v1536_v39  ;;  %2725 = vmatprep.mubr.msk.bf16.mxu0 %vm3290_vm4, %v3289_v16 }
 0x645   : > { %2696 = vmatmul.mubr.msk.bf16.vlgmr.msra.gmra.mxu1 %vm1170_vm6, %v1193_v40  ;;  %2735 = vmatprep.subr.bf16.mxu0 %v3289_v16 }
 0x646   : > { %2700 = vmatpush3.bf16.xpose.msra.mxu1 %v1259_v41  ;;  %2701 = vmatprep.mubr.msk.bf16.mxu1 %vm3290_vm4, %v3289_v16 }
 0x647   : > { %2705 = vmatprep.subr.bf16.mxu1 %v3289_v16 }
 0x64b   : > { %2726 = vmatmul.mubr.msk.bf16.vlgmr.msra.gmra.mxu0 %vm1120_vm5, %v1529_v42 }
 0x64c   : > { %2751 = vmatprep.mubr.msk.bf16.mxu0 %vm3290_vm4, %v3289_v16 }
 0x64d   : > { %2702 = vmatmul.mubr.msk.bf16.vlgmr.msra.gmra.mxu1 %vm1120_vm5, %v1251_v27 }
 0x64e   : > { %2707 = vmatprep.mubr.msk.bf16.mxu1 %vm3290_vm4, %v3289_v16 }
 0x703   : > { %v1434_v45 = vpop.f32.mrf.mxu0 }
 0x704   : > { %v1441_v62 = vmul.f32 0.17677669, %v1434_v45 }
 0x705   : > { %v1231_v46 = vpop.f32.mrf.mxu1  ;;  %v2715_v47 = vpop.f32.mrf.mxu0 }
 0x706   : > { %v2550_v48 = vpack.c.bf16 %v1231_v46, %v1231_v46  ;;  %v1443_v7 = vsel %vm1170_vm6, %v1441_v62, -inf }
 0x707   : > { %v2697_v49 = vpop.f32.mrf.mxu1  ;;  %v1437_v50 = vpop.f32.mrf.mxu0 }
 0x708   : > { %1247 = vst.msk [vmem:[#allocation3] sm:$0xf] %vm1246_vm7, %v2550_v48  ;;  %v1442_v5 = vmul.f32 0.17677669, %v1437_v50 }
 0x709   : > { %v1234_v52 = vpop.f32.mrf.mxu1  ;;  %v2716_v53 = vpop.f32.mrf.mxu0 }
 0x70a   : > { %v2551_v54 = vpack.c.bf16 %v1234_v52, %v1234_v52  ;;  %v1446_v10 = vsel %vm1170_vm6, %v1442_v5, -inf }
 0x70b   : > { %v2698_v55 = vpop.f32.mrf.mxu1  ;;  %v1572_v56 = vpop.f32.mrf.mxu0 }
 0x70c   : > { %1248 = vst.msk [vmem:[#allocation3 + $0x4] sm:$0xf] %vm1246_vm7, %v2551_v54  ;;  %v1579_v9 = vmul.f32 0.17677669, %v1572_v56 }
 0x70d   : > { %v1295_v57 = vpop.f32.mrf.mxu1  ;;  %v2727_v58 = vpop.f32.mrf.mxu0 }
 0x70e   : > { %v1302_v59 = vmul.f32 0.17677669, %v1295_v57  ;;  %v1581_v12 = vsel %vm1170_vm6, %v1579_v9, -inf }
 0x70f   : > { %v2703_v60 = vpop.f32.mrf.mxu1  ;;  %v1575_v61 = vpop.f32.mrf.mxu0 }
 0x710   : > { %v1304_v63 = vsel %vm1170_vm6, %v1302_v59, -inf  ;;  %v1580_v6 = vmul.f32 0.17677669, %v1575_v61 }
 0x711   : > { %v2728_v0 = vpop.f32.mrf.mxu0  ;;  %1305 = vmax.xlane.f32.xlu0 %v1304_v63  ;;  %v1298_v1 = vpop.f32.mrf.mxu1 }
 0x712   : > { %v1303_v2 = vmul.f32 0.17677669, %v1298_v1  ;;  %v1584_v11 = vsel %vm1170_vm6, %v1580_v6, -inf }
 0x713   : > { %v2704_v3 = vpop.f32.mrf.mxu1 }
 0x714   : > { %v1307_v8 = vsel %vm1170_vm6, %v1303_v2, -inf }
 0x715   : > { %1444 = vmax.xlane.f32.xlu0 %v1443_v7  ;;  %1308 = vmax.xlane.f32.xlu1 %v1307_v8 }
 0x719   : > { %1447 = vmax.xlane.f32.xlu0 %v1446_v10  ;;  %1585 = vmax.xlane.f32.xlu1 %v1584_v11  ;;  %v2909_v10 = vld [vmem:[%s3628_s6 + $0x38] sm:$0xff]   ;;  %v2910_v11 = vld [vmem:[%s3628_s6 + $0x30] sm:$0xff]  }
 0x71a   : > { %2736 = vmatpush3.bf16.msra.mxu0 %v2909_v10  ;;  %v2933_v10 = vld [vmem:[%s3630_s12 + $0x20] ss:$8 sps:$4 sm:$0xff]  }
 0x71b   : > { %2737 = vmatprep.subr.bf16.mxu0 %v3289_v16 }
 0x71d   : > { %1582 = vmax.xlane.f32.xlu0 %v1581_v12  ;;  %v2911_v12 = vld [vmem:[%s3628_s6 + $0x28] sm:$0xff]  }
 0x71e   : > { %2738 = vmatpush3.bf16.msra.mxu0 %v2910_v11  ;;  %v2938_v11 = vld [vmem:[%s3630_s12 + $0x14] ss:$8 sps:$4 sm:$0xff]  }
 0x71f   : > { %2739 = vmatprep.subr.bf16.mxu0 %v3289_v16 }
 0x722   : > { %2740 = vmatpush3.bf16.msra.mxu0 %v2911_v12  ;;  %v2936_v12 = vld [vmem:[%s3630_s12 + $0x10] ss:$8 sps:$4 sm:$0xff]  }
 0x723   : > { %2741 = vmatprep.subr.bf16.mxu0 %v3289_v16 }
 0x79a   : > { %v1306_v13 = vpop.xlane.xlu0 %1305 }
 0x79b   : > { %v1310_v24 = vsub.f32 %v1302_v59, %v1306_v13  ;;  %v2912_v13 = vld [vmem:[%s3628_s6 + $0x20] sm:$0xff]  }
 0x79c   : > { %2742 = vmatpush3.bf16.msra.mxu0 %v2912_v13  ;;  %v2941_v13 = vld [vmem:[%s3630_s12 + $0x4] ss:$8 sps:$4 sm:$0xff]  }
 0x79d   : > { %v1312_v30 = vmul.f32 1.442695, %v1310_v24  ;;  %2743 = vmatprep.subr.bf16.mxu0 %v3289_v16 }
 0x79e   : > { %v1445_v14 = vpop.xlane.xlu0 %1444  ;;  %v1309_v17 = vpop.xlane.xlu1 %1308 }
 0x79f   : > { %v1449_v18 = vsub.f32 %v1441_v62, %v1445_v14  ;;  %v1311_v25 = vsub.f32 %v1303_v2, %v1309_v17 }
 0x7a1   : > { %v1451_v19 = vmul.f32 1.442695, %v1449_v18  ;;  %v1314_v31 = vmul.f32 1.442695, %v1311_v25  ;;  %v2913_v18 = vld [vmem:[%s3628_s6 + $0x18] sm:$0xff]  }
 0x7a2   : > { %v1448_v20 = vpop.xlane.xlu0 %1447  ;;  %v1586_v21 = vpop.xlane.xlu1 %1585  ;;  %2744 = vmatpush3.bf16.msra.mxu0 %v2913_v18 }
 0x7a3   : > { %2966 = vpow2.f32 %v1451_v19  ;;  %v1450_v22 = vsub.f32 %v1442_v5, %v1448_v20  ;;  %v1588_v23 = vsub.f32 %v1580_v6, %v1586_v21  ;;  %2745 = vmatprep.subr.bf16.mxu0 %v3289_v16 }
 0x7a5   : > { %v1453_v26 = vmul.f32 1.442695, %v1450_v22  ;;  %v1591_v27 = vmul.f32 1.442695, %v1588_v23  ;;  %v2914_v22 = vld [vmem:[%s3628_s6 + $0x10] sm:$0xff]  }
 0x7a6   : > { %v1583_v28 = vpop.xlane.xlu0 %1582  ;;  %2746 = vmatpush3.bf16.msra.mxu0 %v2914_v22 }
 0x7a7   : > { %2968 = vpow2.f32 %v1453_v26  ;;  %v1587_v29 = vsub.f32 %v1579_v9, %v1583_v28  ;;  %2747 = vmatprep.subr.bf16.mxu0 %v3289_v16  ;;  %v2915_v26 = vld [vmem:[%s3628_s6 + $0x8] sm:$0xff]   ;;  %v2916_v28 = vld [vmem:[%s3628_s6] sm:$0xff]  }
 0x7a8   : > { %2970 = vpow2.f32 %v1591_v27 }
 0x7a9   : > { %v1589_v32 = vmul.f32 1.442695, %v1587_v29 }
 0x7aa   : > { %2748 = vmatpush3.bf16.msra.mxu0 %v2915_v26 }
 0x7ab   : > { %2972 = vpow2.f32 %v1589_v32  ;;  %2749 = vmatprep.subr.bf16.mxu0 %v3289_v16 }
 0x7ac   : > { %2974 = vpow2.f32 %v1312_v30 }
 0x7ad   : > { %2976 = vpow2.f32 %v1314_v31 }
 0x7ae   : > { %2750 = vmatpush3.bf16.msra.mxu0 %v2916_v28  ;;  %v2506_v28 = vld [vmem:[%s3651_s3 + $0x2] ss:$0 sm:$0xff] }
 0x7b0   : > { %v2967_v33 = vpop.eup %2966 }
 0x7b1   : > { %v1455_v34 = vsel %vm1170_vm6, %v2967_v33, 0.0 }
 0x7b2   : > { %1456 = vadd.xlane.f32.xlu0 %v1455_v34 }
 0x7b4   : > { %v2969_v35 = vpop.eup %2968 }
 0x7b5   : > { %v1458_v38 = vsel %vm1170_vm6, %v2969_v35, 0.0  ;;  %v2971_v39 = vpop.eup %2970 }
 0x7b6   : > { %1459 = vadd.xlane.f32.xlu1 %v1458_v38  ;;  %v1596_v45 = vsel %vm1170_vm6, %v2971_v39, 0.0 }
 0x7b8   : > { %v2973_v40 = vpop.eup %2972 }
 0x7b9   : > { %v2975_v41 = vpop.eup %2974  ;;  %v1593_v42 = vsel %vm1170_vm6, %v2973_v40, 0.0 }
 0x7ba   : > { %v2977_v46 = vpop.eup %2976  ;;  %1594 = vadd.xlane.f32.xlu0 %v1593_v42  ;;  %1597 = vadd.xlane.f32.xlu1 %v1596_v45  ;;  %v1316_v47 = vsel %vm1170_vm6, %v2975_v41, 0.0 }
 0x7bb   : > { %v1319_v48 = vsel %vm1170_vm6, %v2977_v46, 0.0 }
 0x7be   : > { %1317 = vadd.xlane.f32.xlu0 %v1316_v47  ;;  %1320 = vadd.xlane.f32.xlu1 %v1319_v48  ;;  %v2495_v47 = vld [vmem:[%s3651_s3] ss:$0 sm:$0xff] }
 0x7cf   : > { %1466 = vrot.lane.b32.xlu1 %v3737_v4, %s3293_s21 }
 0x7d3   : > { %1604 = vrot.lane.b32.xlu1 %v3737_v4, %s3292_s14 }
 0x7d4   : > { %1328 = vrot.lane.b32.xlu0 %v3737_v4, %s3291_s25 }
 0x83b   : > { %v1457_v49 = vpop.xlane.xlu0 %1456 }
 0x83f   : > { %v1460_v50 = vpop.xlane.xlu1 %1459 }
 0x843   : > { %v1595_v52 = vpop.xlane.xlu0 %1594  ;;  %v1598_v53 = vpop.xlane.xlu1 %1597 }
 0x847   : > { %v1318_v54 = vpop.xlane.xlu0 %1317  ;;  %v1321_v55 = vpop.xlane.xlu1 %1320 }
 0x848   : > { %2978 = vrcp.f32 %v1318_v54 }
 0x849   : > { %2980 = vrcp.f32 %v1321_v55 }
 0x84a   : > { %2982 = vrcp.f32 %v1460_v50 }
 0x84b   : > { %v1329_v56 = vpop.permute.xlu0 %1328  ;;  %2984 = vrcp.f32 %v1457_v49  ;;  %v1467_v62 = vpop.permute.xlu1 %1466 }
 0x84c   : > { %2706 = vmatpush3.bf16.msra.mxu1 %v1329_v56  ;;  %2986 = vrcp.f32 %v1595_v52 }
 0x84d   : > { %2717 = vmatprep.subr.bf16.mxu1 %v3289_v16  ;;  %2988 = vrcp.f32 %v1598_v53 }
 0x84f   : > { %v1605_v6 = vpop.permute.xlu1 %1604 }
 0x855   : > { %v2979_v57 = vpop.eup %2978 }
 0x856   : > { %v2981_v58 = vpop.eup %2980  ;;  %v1324_v59 = vmul.f32 %v2979_v57, %v2975_v41  ;;  %v2918_v57 = vld [vmem:[%s3630_s12 + $0x70] ss:$8 sps:$4 sm:$0xff]  }
 0x857   : > { %v1325_v4 = vmul.f32 %v2981_v58, %v2977_v46  ;;  %v2983_v61 = vpop.eup %2982  ;;  %v2920_v58 = vld [vmem:[%s3630_s12 + $0x74] ss:$8 sps:$4 sm:$0xff]  }
 0x858   : > { %v2985_v63 = vpop.eup %2984  ;;  %v1464_v0 = vmul.f32 %v2983_v61, %v2969_v35 }
 0x859   : > { %v1326_v60 = vpack.c.bf16 %v1325_v4, %v1324_v59  ;;  %v1463_v1 = vmul.f32 %v2985_v63, %v2967_v33  ;;  %v2987_v2 = vpop.eup %2986 }
 0x85a   : > { %v2989_v5 = vpop.eup %2988  ;;  %v1601_v7 = vmul.f32 %v2987_v2, %v2973_v40  ;;  %v2926_v2 = vld [vmem:[%s3630_s12 + $0x54] ss:$8 sps:$4 sm:$0xff]  }
 0x85b   : > { %2708 = vmatmul.mubr.msk.bf16.vlgmr.msra.gmra.mxu1 %vm1170_vm6, %v1326_v60  ;;  %v1465_v3 = vpack.c.bf16 %v1464_v0, %v1463_v1  ;;  %v1602_v8 = vmul.f32 %v2989_v5, %v2971_v39  ;;  %v2923_v0 = vld [vmem:[%s3630_s12 + $0x64] ss:$8 sps:$4 sm:$0xff]   ;;  %v2921_v1 = vld [vmem:[%s3630_s12 + $0x60] ss:$8 sps:$4 sm:$0xff]  }
 0x85c   : > { %2718 = vmatpush3.bf16.msra.mxu1 %v1467_v62  ;;  %2719 = vmatprep.mubr.msk.bf16.mxu1 %vm3290_vm4, %v3289_v16  ;;  %v2927_v5 = vld [vmem:[%s3630_s12 + $0x40] ss:$8 sps:$4 sm:$0xff]  }
 0x85d   : > { %2729 = vmatprep.subr.bf16.mxu1 %v3289_v16  ;;  %v1603_v9 = vpack.c.bf16 %v1602_v8, %v1601_v7  ;;  %v2932_v7 = vld [vmem:[%s3630_s12 + $0x34] ss:$8 sps:$4 sm:$0xff]   ;;  %v2930_v8 = vld [vmem:[%s3630_s12 + $0x30] ss:$8 sps:$4 sm:$0xff]  }
 0x863   : > { %2720 = vmatmul.mubr.msk.bf16.vlgmr.msra.gmra.mxu1 %vm1170_vm6, %v1465_v3  ;;  %v2924_v3 = vld [vmem:[%s3630_s12 + $0x50] ss:$8 sps:$4 sm:$0xff]  }
 0x864   : > { %2730 = vmatpush3.bf16.msra.mxu1 %v1605_v6  ;;  %2731 = vmatprep.mubr.msk.bf16.mxu1 %vm3290_vm4, %v3289_v16  ;;  %v2929_v6 = vld [vmem:[%s3630_s12 + $0x44] ss:$8 sps:$4 sm:$0xff]  }
 0x865   : > { %1932 = vmatprep.subr.bf16.mxu1 %v2920_v58 }
 0x86b   : > { %2732 = vmatmul.mubr.msk.bf16.vlgmr.msra.gmra.mxu1 %vm1170_vm6, %v1603_v9  ;;  %v2935_v9 = vld [vmem:[%s3630_s12 + $0x24] ss:$8 sps:$4 sm:$0xff]  }
 0x86c   : > { %1964 = vmatprep.mubr.bf16.mxu1 %v3288_v15  ;;  %1933 = vmatpush1.bf16.msra.mxu1 %v2918_v57 }
 0x86d   : > { %1934 = vmatprep.subr.bf16.mxu1 %v2923_v0 }
 0x870   : > { %1935 = vmatpush1.bf16.msra.mxu1 %v2921_v1 }
 0x871   : > { %1936 = vmatprep.subr.bf16.mxu1 %v2926_v2 }
 0x874   : > { %1937 = vmatpush1.bf16.msra.mxu1 %v2924_v3 }
 0x875   : > { %1938 = vmatprep.subr.bf16.mxu1 %v2929_v6 }
 0x878   : > { %1939 = vmatpush1.bf16.msra.mxu1 %v2927_v5 }
 0x879   : > { %1940 = vmatprep.subr.bf16.mxu1 %v2932_v7 }
 0x87c   : > { %1941 = vmatpush1.bf16.msra.mxu1 %v2930_v8 }
 0x87d   : > { %1942 = vmatprep.subr.bf16.mxu1 %v2935_v9 }
 0x880   : > { %1943 = vmatpush1.bf16.msra.mxu1 %v2933_v10 }
 0x881   : > { %1944 = vmatprep.subr.bf16.mxu1 %v2938_v11 }
 0x884   : > { %1945 = vmatpush1.bf16.msra.mxu1 %v2936_v12 }
 0x885   : > { %1946 = vmatprep.subr.bf16.mxu1 %v2941_v13 }
 0x91b   : > { %v1368_v14 = vpop.f32.mrf.mxu1 }
 0x91c   : > { %v2552_v17 = vpack.c.bf16 %v1368_v14, %v1368_v14  ;;  %v2939_v14 = vld [vmem:[%s3630_s12] ss:$8 sps:$4 sm:$0xff]  }
 0x91d   : > { %v2709_v15 = vpop.f32.mrf.mxu1  ;;  %1947 = vmatpush1.bf16.msra.mxu1 %v2939_v14 }
 0x91e   : > { %1381 = vrot.lane.b32.xlu1 %v2552_v17, %s3292_s14 }
 0x91f   : > { %v1371_v19 = vpop.f32.mrf.mxu1 }
 0x920   : > { %v2553_v20 = vpack.c.bf16 %v1371_v19, %v1371_v19 }
 0x921   : > { %v2710_v21 = vpop.f32.mrf.mxu1 }
 0x922   : > { %1383 = vrot.lane.b32.xlu0 %v2553_v20, %s3292_s14 }
 0x923   : > { %v1506_v23 = vpop.f32.mrf.mxu1 }
 0x924   : > { %v2554_v24 = vpack.c.bf16 %v1506_v23, %v1506_v23 }
 0x925   : > { %v2721_v25 = vpop.f32.mrf.mxu1 }
 0x926   : > { %1519 = vrot.lane.b32.xlu1 %v2554_v24, %s3293_s21  ;;  %v2505_v24 = vld [vmem:[%s3651_s3 + $0x1] ss:$0 sm:$0xff] }
 0x927   : > { %v1509_v27 = vpop.f32.mrf.mxu1 }
 0x928   : > { %v2555_v29 = vpack.c.bf16 %v1509_v27, %v1509_v27 }
 0x929   : > { %v2722_v30 = vpop.f32.mrf.mxu1 }
 0x92a   : > { %1521 = vrot.lane.b32.xlu0 %v2555_v29, %s3293_s21 }
 0x92b   : > { %v1644_v31 = vpop.f32.mrf.mxu1 }
 0x92c   : > { %v2556_v32 = vpack.c.bf16 %v1644_v31, %v1644_v31 }
 0x92d   : > { %v2733_v33 = vpop.f32.mrf.mxu1 }
 0x92e   : > { %1657 = vrot.lane.b32.xlu1 %v2556_v32, %s3291_s25  ;;  %v2942_v33 = vld [vmem:[%s3653_s0 + $0x78] sm:$0xff]  }
 0x92f   : > { %v1647_v34 = vpop.f32.mrf.mxu1  ;;  %2610 = vmatprep.subr.bf16.mxu0 %v2942_v33 }
 0x930   : > { %v2557_v35 = vpack.c.bf16 %v1647_v34, %v1647_v34  ;;  %v2943_v34 = vld [vmem:[%s3653_s0 + $0x38] sm:$0xff]  }
 0x931   : > { %v2734_v38 = vpop.f32.mrf.mxu1 }
 0x932   : > { %1659 = vrot.lane.b32.xlu0 %v2557_v35, %s3291_s25  ;;  %v2944_v35 = vld [vmem:[%s3653_s0 + $0x70] sm:$0xff]  }
 0x933   : > { %v2945_v38 = vld [vmem:[%s3653_s0 + $0x30] sm:$0xff]  }
 0x990   : > { %v1382_v39 = vpop.permute.xlu1 %1381 }
 0x991   : > { %1388 = vst.msk [vmem:[#allocation3] sm:$0xf] %vm1387_vm8, %v1382_v39  ;;  %v2946_v39 = vld [vmem:[%s3653_s0 + $0x68] sm:$0xff]  }
 0x994   : > { %v1384_v40 = vpop.permute.xlu0 %1383 }
 0x995   : > { %1389 = vst.msk [vmem:[#allocation3 + $0x4] sm:$0xf] %vm1387_vm8, %v1384_v40  ;;  %v2947_v40 = vld [vmem:[%s3653_s0 + $0x28] sm:$0xff]  }
 0x998   : > { %v1520_v16 = vpop.permute.xlu1 %1519 }
 0x999   : > { %1526 = vst.msk [vmem:[#allocation3] sm:$0xf] %vm1525_vm9, %v1520_v16  ;;  %v2948_v16 = vld [vmem:[%s3653_s0 + $0x60] sm:$0xff]  }
 0x99c   : > { %v1522_v41 = vpop.permute.xlu0 %1521 }
 0x99d   : > { %1527 = vst.msk [vmem:[#allocation3 + $0x4] sm:$0xf] %vm1525_vm9, %v1522_v41  ;;  %v2949_v41 = vld [vmem:[%s3653_s0 + $0x20] sm:$0xff]  }
 0x9a0   : > { %v1658_v42 = vpop.permute.xlu1 %1657 }
 0x9a1   : > { %1664 = vst.msk [vmem:[#allocation3] sm:$0xf] %vm1663_vm10, %v1658_v42  ;;  %v2950_v42 = vld [vmem:[%s3653_s0 + $0x58] sm:$0xff]  }
 0x9a4   : > { %v1660_v45 = vpop.permute.xlu0 %1659 }
 0x9a5   : > { %1665 = vst.msk [vmem:[#allocation3 + $0x4] sm:$0xf] %vm1663_vm10, %v1660_v45  ;;  %v2951_v45 = vld [vmem:[%s3653_s0 + $0x18] sm:$0xff]  }
 0x9ac   : > { %v2917_v46 = vld [vmem:[#allocation3] sm:$0xff]  }
 0x9ad   : > { %2752 = vmatmul.mubr.bf16.vlgmr.msra.gmra.mxu0 %v2917_v46  ;;  %v2952_v46 = vld [vmem:[%s3653_s0 + $0x50] sm:$0xff]  }
 0x9ae   : > { %2611 = vmatpush3.bf16.msra.mxu0 %v2943_v34 }
 0x9af   : > { %2612 = vmatprep.subr.bf16.mxu0 %v2944_v35 }
 0x9b2   : > { %2613 = vmatpush3.bf16.msra.mxu0 %v2945_v38 }
 0x9b3   : > { %2614 = vmatprep.subr.bf16.mxu0 %v2946_v39  ;;  %v2523_v39 = vld [vmem:[%s3651_s3 + $0x3] ss:$0 sm:$0xff] }
 0x9b6   : > { %2615 = vmatpush3.bf16.msra.mxu0 %v2947_v40 }
 0x9b7   : > { %2616 = vmatprep.subr.bf16.mxu0 %v2948_v16 }
 0x9ba   : > { %2617 = vmatpush3.bf16.msra.mxu0 %v2949_v41 }
 0x9bb   : > { %2618 = vmatprep.subr.bf16.mxu0 %v2950_v42 }
 0x9be   : > { %2619 = vmatpush3.bf16.msra.mxu0 %v2951_v45 }
 0x9bf   : > { %2620 = vmatprep.subr.bf16.mxu0 %v2952_v46 }
 0xa6d   : > { %v1777_v48 = vpop.f32.mrf.mxu0 }
 0xa6e   : > { %v1778_v49 = vadd.f32 %v2495_v47, %v1777_v48  ;;  %v2954_v48 = vld [vmem:[%s3653_s0 + $0x48] sm:$0xff]  }
 0xa6f   : > { %v2753_v50 = vpop.f32.mrf.mxu0 }
 0xa70   : > { %v1784_v52 = vadd.f32 %v1778_v49, %v3701_v36  ;;  %v2955_v49 = vld [vmem:[%s3653_s0 + $0x8] sm:$0xff]   ;;  %v2956_v50 = vld [vmem:[%s3653_s0 + $0x40] sm:$0xff]  }
 0xa71   : > { %v1780_v53 = vpop.f32.mrf.mxu0 }
 0xa72   : > { %v1781_v54 = vadd.f32 %v2495_v47, %v1780_v53  ;;  %1788 = vadd.xlane.f32.xlu1 %v1784_v52  ;;  %v2953_v47 = vld [vmem:[%s3653_s0 + $0x10] sm:$0xff]   ;;  %v1840_v53 = vld [vmem:[%s3641_s15] sm:$0x3] }
 0xa73   : > { %v2754_v55 = vpop.f32.mrf.mxu0  ;;  %2621 = vmatpush3.bf16.msra.mxu0 %v2953_v47 }
 0xa74   : > { %v1785_v56 = vadd.f32 %v1781_v54, %v3703_v37  ;;  %2622 = vmatprep.subr.bf16.mxu0 %v2954_v48  ;;  %v1845_v54 = vrot.slane %v1840_v53, %v892_v51  ;;  %v1849_v55 = vrot.slane %v1840_v53, %v896_v44 }
 0xa76   : > { %1790 = vadd.xlane.f32.xlu0 %v1785_v56 }
 0xa77   : > { %2623 = vmatpush3.bf16.msra.mxu0 %v2955_v49 }
 0xa78   : > { %2624 = vmatprep.subr.bf16.mxu0 %v2956_v50 }
 0xafb   : > { %v1789_v59 = vpop.xlane.xlu1 %1788 }
 0xafc   : > { %v1793_v4 = vmul.f32 0.0078125, %v1789_v59 }
 0xafe   : > { %v1795_v60 = vsub.f32 %v1784_v52, %v1793_v4  ;;  %v2957_v52 = vld [vmem:[%s3653_s0] sm:$0xff]  }
 0xaff   : > { %v1791_v36 = vpop.xlane.xlu0 %1790  ;;  %2625 = vmatpush3.bf16.msra.mxu0 %v2957_v52 }
 0xb00   : > { %v1794_v61 = vmul.f32 0.0078125, %v1791_v36  ;;  %v1797_v62 = vmul.f32 %v1795_v60, %v1795_v60 }
 0xb02   : > { %v1796_v63 = vsub.f32 %v1785_v56, %v1794_v61  ;;  %1799 = vadd.xlane.f32.xlu0 %v1797_v62 }
 0xb04   : > { %v1798_v37 = vmul.f32 %v1796_v63, %v1796_v63 }
 0xb06   : > { %1801 = vadd.xlane.f32.xlu0 %v1798_v37 }
 0xb8b   : > { %v1800_v17 = vpop.xlane.xlu0 %1799 }
 0xb8c   : > { %v1803_v15 = vmul.f32 0.0078125, %v1800_v17 }
 0xb8e   : > { %v1805_v18 = vadd.f32 1e-12, %v1803_v15 }
 0xb8f   : > { %v1802_v19 = vpop.xlane.xlu0 %1801 }
 0xb90   : > { %2990 = vrsqrt.f32 %v1805_v18  ;;  %v1804_v20 = vmul.f32 0.0078125, %v1802_v19 }
 0xb92   : > { %v1806_v21 = vadd.f32 1e-12, %v1804_v20 }
 0xb94   : > { %2992 = vrsqrt.f32 %v1806_v21 }
 0xb9d   : > { %v2991_v22 = vpop.eup %2990 }
 0xb9e   : > { %v1809_v23 = vmul.f32 %v2991_v22, %v1795_v60 }
 0xba0   : > { %v1815_v27 = vmul.f32 %v2505_v24, %v1809_v23 }
 0xba1   : > { %v2993_v25 = vpop.eup %2992 }
 0xba2   : > { %v1810_v26 = vmul.f32 %v2993_v25, %v1796_v63  ;;  %v3839_v30 = vadd.f32 %v2506_v28, %v1815_v27 }
 0xba4   : > { %v1816_v29 = vmul.f32 %v2505_v24, %v1810_v26 }
 0xba6   : > { %v3841_v31 = vadd.f32 %v2506_v28, %v1816_v29 }
 0xba8   : > { %v1823_v32 = vpack.c.bf16 %v3841_v31, %v3839_v30 }
 0xbaa   : > { %1965 = vmatmul.mubr.bf16.vlgmr.msra.gmra.mxu1 %v1823_v32 }
 0xc6a   : > { %v1966_v56 = vpop.f32.mrf.mxu1 }
 0xc6b   : > { %v1967_v57 = vadd.f32 %v1966_v56, %v1845_v54 }
 0xc6c   : > { %v1968_v58 = vpop.f32.mrf.mxu1 }
 0xc6d   : > { %v1975_v59 = vmul.f32 %v1967_v57, %v1967_v57  ;;  %v1969_v4 = vadd.f32 %v1968_v58, %v1849_v55 }
 0xc6e   : > { %v1970_v60 = vpop.f32.mrf.mxu1 }
 0xc6f   : > { %v1979_v36 = vmul.f32 %v1975_v59, %v1967_v57  ;;  %v1976_v61 = vmul.f32 %v1969_v4, %v1969_v4  ;;  %v1971_v62 = vadd.f32 %v1970_v60, %v1845_v54 }
 0xc70   : > { %v1972_v63 = vpop.f32.mrf.mxu1 }
 0xc71   : > { %v1983_v37 = vmul.f32 0.044715, %v1979_v36  ;;  %v1980_v0 = vmul.f32 %v1976_v61, %v1969_v4  ;;  %v1977_v1 = vmul.f32 %v1971_v62, %v1971_v62  ;;  %v1973_v2 = vadd.f32 %v1972_v63, %v1849_v55 }
 0xc73   : > { %v1987_v3 = vadd.f32 %v1983_v37, %v1967_v57  ;;  %v1984_v5 = vmul.f32 0.044715, %v1980_v0  ;;  %v1981_v51 = vmul.f32 %v1977_v1, %v1971_v62  ;;  %v1978_v6 = vmul.f32 %v1973_v2, %v1973_v2  ;;  %v2541_v37 = vld [vmem:[%s3651_s3 + $0x5] ss:$0 sm:$0xff] }
 0xc75   : > { %v1991_v43 = vmul.f32 0.7978846, %v1987_v3  ;;  %v1988_v44 = vadd.f32 %v1984_v5, %v1969_v4  ;;  %v1985_v7 = vmul.f32 0.044715, %v1981_v51  ;;  %v1982_v8 = vmul.f32 %v1978_v6, %v1973_v2 }
 0xc77   : > { %v1992_v9 = vmul.f32 0.7978846, %v1988_v44  ;;  %v1989_v10 = vadd.f32 %v1985_v7, %v1971_v62  ;;  %v1986_v11 = vmul.f32 0.044715, %v1982_v8  ;;  %2994 = vtanh.f32 %v1991_v43 }
 0xc79   : > { %2996 = vtanh.f32 %v1992_v9  ;;  %v1993_v12 = vmul.f32 0.7978846, %v1989_v10  ;;  %v1990_v13 = vadd.f32 %v1986_v11, %v1973_v2 }
 0xc7b   : > { %2998 = vtanh.f32 %v1993_v12  ;;  %v1994_v14 = vmul.f32 0.7978846, %v1990_v13 }
 0xc7d   : > { %3000 = vtanh.f32 %v1994_v14 }
 0xc84   : > { %v2995_v17 = vpop.eup %2994 }
 0xc85   : > { %v1999_v20 = vadd.f32 1.0, %v2995_v17 }
 0xc86   : > { %v2997_v15 = vpop.eup %2996 }
 0xc87   : > { %v2000_v18 = vadd.f32 1.0, %v2997_v15  ;;  %v2003_v26 = vmul.f32 0.5, %v1999_v20 }
 0xc88   : > { %v2999_v19 = vpop.eup %2998 }
 0xc89   : > { %v2001_v21 = vadd.f32 1.0, %v2999_v19  ;;  %v2004_v25 = vmul.f32 0.5, %v2000_v18  ;;  %v2007_v33 = vmul.f32 %v2003_v26, %v1967_v57 }
 0xc8a   : > { %v3001_v22 = vpop.eup %3000 }
 0xc8b   : > { %v2005_v23 = vmul.f32 0.5, %v2001_v21  ;;  %v2002_v24 = vadd.f32 1.0, %v3001_v22  ;;  %v2008_v29 = vmul.f32 %v2004_v25, %v1969_v4 }
 0xc8d   : > { %v2006_v27 = vmul.f32 0.5, %v2002_v24  ;;  %v2009_v28 = vmul.f32 %v2005_v23, %v1971_v62  ;;  %v2540_v62 = vld [vmem:[%s3651_s3 + $0x4] ss:$0 sm:$0xff] }
 0xc8f   : > { %v2010_v32 = vmul.f32 %v2006_v27, %v1973_v2  ;;  %v2011_v35 = vpack.c.bf16 %v2009_v28, %v2007_v33 }
 0xc91   : > { %v2012_v34 = vpack.c.bf16 %v2010_v32, %v2008_v29 }
 0xc93   : > { %2178 = vmatprep.mubr.bf16.mxu0 %v2012_v34 }
 0xc94   : > { %2179 = vmatmul.mubr.bf16.vlgmr.msra.gmra.mxu0 %v2011_v35 }
 0xd54   : > { %v2626_v38 = vpop.f32.mrf.mxu0 }
 0xd56   : > { %v2627_v40 = vpop.f32.mrf.mxu0 }
 0xd57   : > { %v2628_v16 = vadd.f32 %v2627_v40, %v2626_v38 }
 0xd58   : > { %v2629_v41 = vpop.f32.mrf.mxu0 }
 0xd59   : > { %v2181_v42 = vadd.f32 %v2628_v16, %v2523_v39 }
 0xd5a   : > { %v2630_v45 = vpop.f32.mrf.mxu0 }
 0xd5b   : > { %v2631_v46 = vadd.f32 %v2630_v45, %v2629_v41  ;;  %v2187_v47 = vadd.f32 %v2181_v42, %v3839_v30 }
 0xd5d   : > { %v2184_v48 = vadd.f32 %v2631_v46, %v2523_v39  ;;  %2191 = vadd.xlane.f32.xlu1 %v2187_v47 }
 0xd5f   : > { %v2188_v49 = vadd.f32 %v2184_v48, %v3841_v31 }
 0xd61   : > { %2193 = vadd.xlane.f32.xlu0 %v2188_v49 }
 0xde6   : > { %v2192_v50 = vpop.xlane.xlu1 %2191 }
 0xde7   : > { %v2195_v52 = vmul.f32 0.0078125, %v2192_v50 }
 0xde9   : > { %v2197_v53 = vsub.f32 %v2187_v47, %v2195_v52 }
 0xdea   : > { %v2194_v54 = vpop.xlane.xlu0 %2193 }
 0xdeb   : > { %v2196_v55 = vmul.f32 0.0078125, %v2194_v54  ;;  %v2199_v56 = vmul.f32 %v2197_v53, %v2197_v53 }
 0xded   : > { %v2198_v57 = vsub.f32 %v2188_v49, %v2196_v55  ;;  %2201 = vadd.xlane.f32.xlu1 %v2199_v56 }
 0xdef   : > { %v2200_v58 = vmul.f32 %v2198_v57, %v2198_v57 }
 0xdf1   : > { %2203 = vadd.xlane.f32.xlu0 %v2200_v58 }
 0xe76   : > { %v2202_v59 = vpop.xlane.xlu1 %2201 }
 0xe77   : > { %v2205_v4 = vmul.f32 0.0078125, %v2202_v59 }
 0xe79   : > { %v2207_v30 = vadd.f32 1e-12, %v2205_v4 }
 0xe7a   : > { %v2204_v60 = vpop.xlane.xlu0 %2203 }
 0xe7b   : > { %3002 = vrsqrt.f32 %v2207_v30  ;;  %v2206_v36 = vmul.f32 0.0078125, %v2204_v60 }
 0xe7d   : > { %v2208_v31 = vadd.f32 1e-12, %v2206_v36 }
 0xe7f   : > { %3004 = vrsqrt.f32 %v2208_v31 }
 0xe88   : > { %v3003_v61 = vpop.eup %3002 }
 0xe89   : > { %v2211_v63 = vmul.f32 %v3003_v61, %v2197_v53 }
 0xe8b   : > { %v2217_v0 = vmul.f32 %v2540_v62, %v2211_v63 }
 0xe8c   : > { %v3005_v1 = vpop.eup %3004 }
 0xe8d   : > { %v2223_v2 = vadd.f32 %v2541_v37, %v2217_v0  ;;  %v2212_v3 = vmul.f32 %v3005_v1, %v2198_v57 }
 0xe8f   : > { %2225 = vst [vmem:[#allocation2] sm:$0xff] %v2223_v2  ;;  %v2218_v5 = vmul.f32 %v2540_v62, %v2212_v3  ;;  %2230 = sbr.rel (%p2542_p12) target bundleno = 3733 (0xe95), region = 108 }
 0xe91   : > { %v2224_v51 = vadd.f32 %v2541_v37, %v2218_v5 }
 0xe93   : > { %2226 = vst [vmem:[#allocation2 + $0x8] sm:$0xff] %v2224_v51 }
 0xe94   : > { %2231 = vst [vmem:[#allocation16] sm:$0xff] %v2223_v2 }
 0xe95 PF: > { %p2813_p6 = scmp.eq.s32.totalorder %s3384_s29, 1  ;;  %s3294_s6 = smov [#allocation16]  }
 0xe96   : > { %s2239_s12 = sshll.u32 %s3294_s6, 4  ;;  %s2240_s12 = int_to_ptr.vmem [resolvable:$true] %s2239_s12 }
 0xe97   : > { %s3196_s15 = scalar_lea.vmem %s2240_s12, 128  ;;  %p3203_p13 = scmp.lt.s32.totalorder %s2240_s12, %s2240_s12 }
 0xe98   : > { %p3197_p7 = scmp.ne.s32.totalorder %s2240_s12, %s3196_s15  ;;  %p3204_p2 = scmp.lt.s32.totalorder %s3196_s15, %s3196_s15 }
 0xe9a   : > { %p3198_p11 = pnand %p3197_p7, %p2813_p6  ;;  %p3205_p3 = por %p3204_p2, %p3203_p13 }
 0xe9c   : > { %p3199_p1 = pneg %p3198_p11 }
 0xe9e   : > { %p3206_p5 = pnand %p3205_p3, %p3199_p1 }
 0xea0   : > { %3209 = shalt.err (!%p3206_p5)
}
 0xea1   : > { %s3963_s3 = sld [smem:[#allocation34_spill]] }
 0xea7   : > { %2780 = dma.vmem_to_hbm [thread:$0]  (%p2813_p6), %s2240_s12, 128, %s3963_s3, [#allocation6]  }
 0xea8   : > { %3253 = dma.done.wait (%p2813_p6), [#allocation6], 128  }
 0xea9   : > { %3255 = vsyncadd (%p2813_p6), [#allocation6], 4294967168 }
 0xeaa PF: > { %s3964_s28 = sld [smem:[#allocation23_spill]]  ;;  %s3967_s25 = smov %s3262_s26 }
 0xeab   : > { %s3965_s0 = sld [smem:[#allocation22_spill]] }
 0xeac   : > { %s3966_s27 = sld [smem:[#allocation24_spill]] }
 0xeb0   : > { %p29_p8 = scmp.ge.s32.totalorder %s3964_s28, 4  }
 0xeb1   : > { %s3968_s26 = smov %s3965_s0 }
 0xeb2   :  { %31 = sbr.rel (!%p29_p8) target bundleno = 19 (0x13), region = 174 }
 0xeb7   :  { %2252 = vsyncpa [#allocation5], 1 }
 0xeb8   :  { %2254 = vsyncpa [#allocation5 + $0x1], 1 }
 0xeb9   :  { %2255 = vsyncpa [#allocation8], 1 }
 0xeba   :  { %2256 = vsyncpa [#allocation11], 1 }
 0xebb   :  { %2258 = vsyncpa [#allocation11 + $0x1], 1 }
 0xebc   :  { %2259 = vsyncpa [#allocation14], 1 }
 0xebd   :  { %2261 = vsyncpa [#allocation14 + $0x1], 1 }
 0xebe   :  { %2262 = vsyncpa [#allocation6], 1 }
 0xebf   :  { %2264 = vsyncpa [#allocation6 + $0x1], 1 }

</bundles_post_ra>
